<compile_context>
chip_gen: v7x
topology: tpu7x:2x2x1
jax: 0.10.0
libtpu: 0.0.40
codegen_flags: <defaults>
</compile_context>

<pallas_src>
import jax
import jax.numpy as jnp
from jax import lax
from jax.experimental import pallas as pl
from jax.experimental.pallas import tpu as pltpu

# ---------------- hyper-parameters (scaled-down SVQVAE, TPU-friendly) ----------------
BATCH = 256              # rows per kernel invocation
N_TILES = 2              # 2 big tiles (v7x dual-TC); 1 extra step is ~0.35us on v5e/v6e
TILE_B = BATCH // N_TILES            # 128 rows per grid step
X_DIM = 32
EMBED_DIM = 8
H_NODES = 32
SCALE = 2
NUM_LAYERS = 1
H2 = H_NODES // (SCALE ** NUM_LAYERS)        # 16
NUM_EMBEDDINGS = 16
NUM_CLASSES = 4
COMMITMENT_COST = 0.25
DIVERGENCE_COST = 0.1

IN_LANES = 64            # input slab: x in lanes [0, X_DIM), y (as f32) at lane X_DIM
OUT_LANES = 128          # lane-dense output slab width (one unmasked full-width store)
STATS_ROWS = 8           # one (8, 128) stats block per grid step (sublane-aligned)

# ---- packed encoder weights, row-stacked (sublane offsets multiples of 8, lane 0) ----
WE1_ROW = 0                                   # (X_DIM,   H_NODES)
WE2_ROW = WE1_ROW + X_DIM                     # (H_NODES, H2)
WE3_ROW = WE2_ROW + H_NODES                   # (H2,      EMBED_DIM)
ENC_ROWS = WE3_ROW + H2                       # 80
ENC_COLS = H_NODES                            # 32

# ---- packed decoder weights, row-stacked ----
WD1_ROW = 0                                   # (EMBED_DIM, H2)
WD2_ROW = WD1_ROW + EMBED_DIM                 # (H2,       H_NODES)
WD3_ROW = WD2_ROW + H2                        # (H_NODES,  X_DIM)
DEC_ROWS = WD3_ROW + H_NODES                  # 56
DEC_COLS = X_DIM                              # 32

# ---- packed biases: one bias per sublane row, lane 0 ----
BE1_ROW, BE2_ROW, BE3_ROW, BD1_ROW, BD2_ROW, BD3_ROW = range(6)
B_ROWS = 8
B_COLS = H_NODES                              # 32

# ---- packed codebook: E (K, D) rows [0, K); E^T (D, K) rows [K, K+D) ----
E_ROW = 0
ET_ROW = NUM_EMBEDDINGS
CB_ROWS = NUM_EMBEDDINGS + EMBED_DIM          # 24
CB_COLS = NUM_EMBEDDINGS                      # 16


def svqvae_kernel(xy_ref, w_enc_ref, w_dec_ref, b_ref, cb_ref, out_ref, stats_ref):
    f32 = jnp.float32
    x = xy_ref[:, 0:X_DIM]                               # (TILE_B, X_DIM)
    y_f = xy_ref[:, X_DIM:X_DIM + 1]                     # (TILE_B, 1) class id as f32

    # -------- static zero-cost views into packed parameter buffers (VMEM-resident) --------
    we1 = w_enc_ref[WE1_ROW:WE1_ROW + X_DIM,   0:H_NODES]
    we2 = w_enc_ref[WE2_ROW:WE2_ROW + H_NODES, 0:H2]
    we3 = w_enc_ref[WE3_ROW:WE3_ROW + H2,      0:EMBED_DIM]
    wd1 = w_dec_ref[WD1_ROW:WD1_ROW + EMBED_DIM, 0:H2]
    wd2 = w_dec_ref[WD2_ROW:WD2_ROW + H2,        0:H_NODES]
    wd3 = w_dec_ref[WD3_ROW:WD3_ROW + H_NODES,   0:X_DIM]
    be1 = b_ref[BE1_ROW:BE1_ROW + 1, 0:H_NODES]
    be2 = b_ref[BE2_ROW:BE2_ROW + 1, 0:H2]
    be3 = b_ref[BE3_ROW:BE3_ROW + 1, 0:EMBED_DIM]
    bd1 = b_ref[BD1_ROW:BD1_ROW + 1, 0:H2]
    bd2 = b_ref[BD2_ROW:BD2_ROW + 1, 0:H_NODES]
    bd3 = b_ref[BD3_ROW:BD3_ROW + 1, 0:X_DIM]
    E   = cb_ref[E_ROW:E_ROW + NUM_EMBEDDINGS, 0:EMBED_DIM]       # (K, D)
    E_t = cb_ref[ET_ROW:ET_ROW + EMBED_DIM, 0:NUM_EMBEDDINGS]     # (D, K) pre-transposed

    # ---------------- encoder MLP (dropout == identity at inference) ----------------
    h = jnp.maximum(jnp.dot(x, we1, preferred_element_type=f32) + be1, 0.0)
    h = jnp.maximum(jnp.dot(h, we2, preferred_element_type=f32) + be2, 0.0)
    z = jnp.dot(h, we3, preferred_element_type=f32) + be3          # (TILE_B, D)

    # ---------------- vector quantization (nearest codebook entry, L2) --------------
    z_sq = jnp.sum(z * z, axis=-1, keepdims=True)                  # (TILE_B, 1)
    e_sq = jnp.sum(E_t * E_t, axis=0, keepdims=True)               # (1, K)
    cross = jnp.dot(z, E_t, preferred_element_type=f32)            # (TILE_B, K)
    dist = z_sq + e_sq - 2.0 * cross
    min_d = jnp.min(dist, axis=1, keepdims=True)
    iota = lax.broadcasted_iota(jnp.int32, dist.shape, 1)
    # first index attaining the minimum (matches torch.argmin tie-breaking)
    idx = jnp.min(jnp.where(dist <= min_d, iota, NUM_EMBEDDINGS),
                  axis=1, keepdims=True)                           # (TILE_B, 1) int32
    onehot = (iota == idx).astype(f32)                             # (TILE_B, K)
    q = jnp.dot(onehot, E, preferred_element_type=f32)             # (TILE_B, D)

    # ---------------- decoder MLP ----------------------------------------------------
    h = jnp.maximum(jnp.dot(q, wd1, preferred_element_type=f32) + bd1, 0.0)
    h = jnp.maximum(jnp.dot(h, wd2, preferred_element_type=f32) + bd2, 0.0)
    x_rec = jnp.dot(h, wd3, preferred_element_type=f32) + bd3      # (TILE_B, X_DIM)

    # -------- one register-assembled lane-dense slab, ONE unmasked store per tile --------
    out_ref[...] = jnp.concatenate(
        [x_rec, idx.astype(f32),
         jnp.zeros((TILE_B, OUT_LANES - X_DIM - 1), f32)], axis=1)

    # ---------------- fused loss / perplexity partial statistics for this tile ------------
    diff = q - z
    mse_sum = jnp.sum(jnp.sum(diff * diff, axis=1, keepdims=True),
                      axis=0, keepdims=True)                       # (1, 1)
    qn = q * lax.rsqrt(jnp.sum(q * q, axis=-1, keepdims=True) + 1e-8)   # EUP rsqrt
    code_counts = jnp.sum(onehot, axis=0, keepdims=True)           # (1, K)
    cls_iota = lax.broadcasted_iota(jnp.int32, (TILE_B, NUM_CLASSES), 1)
    cls_onehot = (y_f.astype(jnp.int32) == cls_iota).astype(f32)   # (TILE_B, C)
    cls_counts = jnp.sum(cls_onehot, axis=0, keepdims=True)        # (1, C)
    # per-class qn sums as ONE MXU contraction over the batch dim -> (C, D)
    qn_cls = lax.dot_general(cls_onehot, qn,
                             dimension_numbers=(((0,), (0,)), ((), ())),
                             preferred_element_type=f32)

    def lanes(a):  # pad a (rows, n) block to (rows, OUT_LANES) in registers
        return jnp.concatenate(
            [a, jnp.zeros((a.shape[0], OUT_LANES - a.shape[1]), f32)], axis=1)

    # (8, 128) stats block assembled in registers, stored once (unmasked)
    stats_ref[...] = jnp.concatenate([
        lanes(code_counts),                                         # row 0: code counts (K)
        lanes(cls_counts),                                          # row 1: class counts (C)
        lanes(mse_sum),                                              # row 2: sum((q-z)^2)
        lanes(qn_cls),                                               # rows 3..6: per-class qn sums
        jnp.zeros((STATS_ROWS - 3 - NUM_CLASSES, OUT_LANES), f32),   # row 7: padding
    ], axis=0)


def init_params(key):
    """PyTorch nn.Linear-style init + VQ uniform codebook, packed into 4 aligned buffers."""
    def linear(k, fan_in, fan_out):
        k1, k2 = jax.random.split(k)
        bound = 1.0 / jnp.sqrt(fan_in)
        w = jax.random.uniform(k1, (fan_in, fan_out), jnp.float32, -bound, bound)
        b = jax.random.uniform(k2, (fan_out,), jnp.float32, -bound, bound)
        return w, b

    keys = jax.random.split(key, 7)
    we1, be1 = linear(keys[0], X_DIM, H_NODES)
    we2, be2 = linear(keys[1], H_NODES, H2)
    we3, be3 = linear(keys[2], H2, EMBED_DIM)
    codebook = jax.random.uniform(keys[3], (NUM_EMBEDDINGS, EMBED_DIM), jnp.float32,
                                  -1.0 / NUM_EMBEDDINGS, 1.0 / NUM_EMBEDDINGS)
    wd1, bd1 = linear(keys[4], EMBED_DIM, H2)
    wd2, bd2 = linear(keys[5], H2, H_NODES)
    wd3, bd3 = linear(keys[6], H_NODES, X_DIM)

    # ---- host-side packing: row-stacked, lane-0, sublane offsets multiples of 8 ----
    w_enc = jnp.zeros((ENC_ROWS, ENC_COLS), jnp.float32)
    w_enc = w_enc.at[WE1_ROW:WE1_ROW + X_DIM,   0:H_NODES].set(we1)
    w_enc = w_enc.at[WE2_ROW:WE2_ROW + H_NODES, 0:H2].set(we2)
    w_enc = w_enc.at[WE3_ROW:WE3_ROW + H2,      0:EMBED_DIM].set(we3)

    w_dec = jnp.zeros((DEC_ROWS, DEC_COLS), jnp.float32)
    w_dec = w_dec.at[WD1_ROW:WD1_ROW + EMBED_DIM, 0:H2].set(wd1)
    w_dec = w_dec.at[WD2_ROW:WD2_ROW + H2,        0:H_NODES].set(wd2)
    w_dec = w_dec.at[WD3_ROW:WD3_ROW + H_NODES,   0:X_DIM].set(wd3)

    b_all = jnp.zeros((B_ROWS, B_COLS), jnp.float32)
    b_all = b_all.at[BE1_ROW, 0:H_NODES].set(be1)
    b_all = b_all.at[BE2_ROW, 0:H2].set(be2)
    b_all = b_all.at[BE3_ROW, 0:EMBED_DIM].set(be3)
    b_all = b_all.at[BD1_ROW, 0:H2].set(bd1)
    b_all = b_all.at[BD2_ROW, 0:H_NODES].set(bd2)
    b_all = b_all.at[BD3_ROW, 0:X_DIM].set(bd3)

    cb_pack = jnp.zeros((CB_ROWS, CB_COLS), jnp.float32)
    cb_pack = cb_pack.at[E_ROW:E_ROW + NUM_EMBEDDINGS, 0:EMBED_DIM].set(codebook)
    cb_pack = cb_pack.at[ET_ROW:ET_ROW + EMBED_DIM, 0:NUM_EMBEDDINGS].set(codebook.T)

    packed = (w_enc, w_dec, b_all, cb_pack)
    raw = (we1, be1, we2, be2, we3, be3, codebook, wd1, bd1, wd2, bd2, wd3, bd3)
    return packed, raw


@jax.jit
def svqvae_forward(x, y, packed_params):
    w_enc, w_dec, b_all, cb_pack = packed_params

    # lane-dense input slab: x in lanes [0, X_DIM), y (as f32) at lane X_DIM
    xy = jnp.concatenate(
        [x, y.astype(jnp.float32)[:, None],
         jnp.zeros((BATCH, IN_LANES - X_DIM - 1), jnp.float32)], axis=1)

    grid_spec = pltpu.PrefetchScalarGridSpec(
        num_scalar_prefetch=0,
        grid=(N_TILES,),
        in_specs=[
            pl.BlockSpec((TILE_B, IN_LANES), lambda i: (i, 0)),       # fused x/y slab
            pl.BlockSpec((ENC_ROWS, ENC_COLS), lambda i: (0, 0)),     # packed enc weights (resident)
            pl.BlockSpec((DEC_ROWS, DEC_COLS), lambda i: (0, 0)),     # packed dec weights (resident)
            pl.BlockSpec((B_ROWS, B_COLS), lambda i: (0, 0)),         # packed biases (resident)
            pl.BlockSpec((CB_ROWS, CB_COLS), lambda i: (0, 0)),       # codebook + codebook^T
        ],
        out_specs=[
            pl.BlockSpec((TILE_B, OUT_LANES), lambda i: (i, 0)),      # lane-dense per-row slab
            pl.BlockSpec((STATS_ROWS, OUT_LANES), lambda i: (i, 0)),  # per-tile stats block
        ],
    )

    out_slab, stats_raw = pl.pallas_call(
        svqvae_kernel,
        out_shape=(
            jax.ShapeDtypeStruct((BATCH, OUT_LANES), jnp.float32),
            jax.ShapeDtypeStruct((N_TILES * STATS_ROWS, OUT_LANES), jnp.float32),
        ),
        grid_spec=grid_spec,
        compiler_params=pltpu.CompilerParams(
            dimension_semantics=("parallel",)),                        # split tiles across TCs (v7x)
    )(xy, w_enc, w_dec, b_all, cb_pack)

    x_recon = out_slab[:, :X_DIM]
    close_indices = out_slab[:, X_DIM].astype(jnp.int32)

    # -------- tiny cross-tile reductions of the fused stats (cheap jitted glue) --------
    stats = stats_raw.reshape(N_TILES, STATS_ROWS, OUT_LANES)
    code_counts = jnp.sum(stats[:, 0, :NUM_EMBEDDINGS], axis=0)        # (K,)
    cls_counts = jnp.sum(stats[:, 1, :NUM_CLASSES], axis=0)            # (C,)
    mse_sum = jnp.sum(stats[:, 2, 0])                                  # scalar
    qn_cls_sums = jnp.sum(stats[:, 3:3 + NUM_CLASSES, :EMBED_DIM], axis=0)   # (C, D)

    mse = mse_sum / (BATCH * EMBED_DIM)
    e_latent_loss = mse        # forward value of mean((sg(q) - z)^2)
    q_latent_loss = mse        # forward value of mean((q - sg(z))^2)

    # div_loss == sum_{i,j: y_i != y_j} qn_i . qn_j / #pairs, via per-class sums
    s_all = jnp.sum(qn_cls_sums, axis=0)
    cross_total = jnp.dot(s_all, s_all)
    same_total = jnp.sum(qn_cls_sums * qn_cls_sums)
    num_pairs = BATCH * BATCH - jnp.sum(cls_counts ** 2)
    div_loss = (cross_total - same_total) / jnp.maximum(num_pairs, 1.0)

    loss = q_latent_loss + COMMITMENT_COST * e_latent_loss + DIVERGENCE_COST * div_loss

    avg_probs = code_counts / BATCH
    perplexity = jnp.exp(-jnp.sum(avg_probs * jnp.log(avg_probs + 1e-10)))

    return loss, x_recon, perplexity, close_indices


def svqvae_reference(x, y, raw_params):
    """Pure-JAX reference of the same forward pass (for validation)."""
    we1, be1, we2, be2, we3, be3, E, wd1, bd1, wd2, bd2, wd3, bd3 = raw_params
    h = jnp.maximum(x @ we1 + be1, 0.0)
    h = jnp.maximum(h @ we2 + be2, 0.0)
    z = h @ we3 + be3
    dist = (jnp.sum(z * z, 1, keepdims=True) + jnp.sum(E * E, 1)[None, :] - 2.0 * (z @ E.T))
    idx = jnp.argmin(dist, axis=1)
    onehot = jax.nn.one_hot(idx, NUM_EMBEDDINGS, dtype=jnp.float32)
    q = onehot @ E
    mse = jnp.mean((q - z) ** 2)
    qn = q / (jnp.linalg.norm(q, axis=1, keepdims=True) + 1e-8)
    sim = qn @ qn.T
    diff_class = (y[:, None] != y[None, :]).astype(jnp.float32)
    div = jnp.sum(sim * diff_class) / jnp.maximum(jnp.sum(diff_class), 1.0)
    loss = mse + COMMITMENT_COST * mse + DIVERGENCE_COST * div
    avg_probs = jnp.mean(onehot, axis=0)
    perplexity = jnp.exp(-jnp.sum(avg_probs * jnp.log(avg_probs + 1e-10)))
    h = jnp.maximum(q @ wd1 + bd1, 0.0)
    h = jnp.maximum(h @ wd2 + bd2, 0.0)
    x_rec = h @ wd3 + bd3
    return loss, x_rec, perplexity, idx.astype(jnp.int32)


if __name__ == "__main__":
    root = jax.random.PRNGKey(0)
    k_x, k_y, k_p = jax.random.split(root, 3)
    x = jax.random.normal(k_x, (BATCH, X_DIM), jnp.float32)
    y = jax.random.randint(k_y, (BATCH,), 0, NUM_CLASSES, jnp.int32)
    packed, raw = init_params(k_p)

    loss, x_recon, perplexity, close_indices = svqvae_forward(x, y, packed)
    jax.block_until_ready((loss, x_recon, perplexity, close_indices))

    assert x_recon.shape == (BATCH, X_DIM)
    assert close_indices.shape == (BATCH,)
    assert bool(jnp.isfinite(loss)) and bool(jnp.isfinite(perplexity))
    assert bool(jnp.all((close_indices >= 0) & (close_indices < NUM_EMBEDDINGS)))

    # Loose aggregate check vs a pure-JAX reference (MXU vs XLA matmul rounding makes
    # exact element-wise equality too strict).
    ref_loss, ref_xrec, ref_ppl, _ = svqvae_reference(x, y, raw)
    assert float(jnp.mean(jnp.abs(x_recon - ref_xrec))) < 1e-2
    assert abs(float(loss) - float(ref_loss)) < 5e-2 * max(1.0, abs(float(ref_loss)))
    assert abs(float(perplexity) - float(ref_ppl)) < 5e-2 * max(1.0, float(ref_ppl))

    print("KERNEL_OK")
</pallas_src>

<mosaic_0001>
module attributes {stable_mosaic.version = 11 : i64} {
  func.func @svqvae_kernel(%arg0: i32, %arg1: memref<128x64xf32, #tpu.memory_space<vmem>>, %arg2: memref<80x32xf32, #tpu.memory_space<vmem>>, %arg3: memref<56x32xf32, #tpu.memory_space<vmem>>, %arg4: memref<8x32xf32, #tpu.memory_space<vmem>>, %arg5: memref<24x16xf32, #tpu.memory_space<vmem>>, %arg6: memref<128x128xf32, #tpu.memory_space<vmem>>, %arg7: memref<8x128xf32, #tpu.memory_space<vmem>>) attributes {dimension_semantics = [#tpu.dimension_semantics<parallel>], iteration_bounds = array<i64: 2>, scalar_prefetch = 0 : i64, scratch_operands = 0 : i64, tpu.core_type = #tpu.core_type<tc>, window_params = [{transform_indices = @transform_0, window_bounds = array<i64: 128, 64>}, {pipeline_mode = #tpu.pipeline_mode<synchronous>, transform_indices = @transform_1, window_bounds = array<i64: 80, 32>}, {pipeline_mode = #tpu.pipeline_mode<synchronous>, transform_indices = @transform_2, window_bounds = array<i64: 56, 32>}, {pipeline_mode = #tpu.pipeline_mode<synchronous>, transform_indices = @transform_3, window_bounds = array<i64: 8, 32>}, {pipeline_mode = #tpu.pipeline_mode<synchronous>, transform_indices = @transform_4, window_bounds = array<i64: 24, 16>}, {transform_indices = @transform_5, window_bounds = array<i64: 128, 128>}, {transform_indices = @transform_6, window_bounds = array<i64: 8, 128>}]} {
    %c0 = arith.constant 0 : index
    %c0_0 = arith.constant 0 : index
    %0 = vector.load %arg1[%c0, %c0_0] : memref<128x64xf32, #tpu.memory_space<vmem>>, vector<128x32xf32>
    %c0_1 = arith.constant 0 : index
    %c32 = arith.constant 32 : index
    %1 = vector.load %arg1[%c0_1, %c32] : memref<128x64xf32, #tpu.memory_space<vmem>>, vector<128x1xf32>
    %c0_2 = arith.constant 0 : index
    %c0_3 = arith.constant 0 : index
    %2 = vector.load %arg2[%c0_2, %c0_3] : memref<80x32xf32, #tpu.memory_space<vmem>>, vector<32x32xf32>
    %c32_4 = arith.constant 32 : index
    %c0_5 = arith.constant 0 : index
    %3 = vector.load %arg2[%c32_4, %c0_5] : memref<80x32xf32, #tpu.memory_space<vmem>>, vector<32x16xf32>
    %c64 = arith.constant 64 : index
    %c0_6 = arith.constant 0 : index
    %4 = vector.load %arg2[%c64, %c0_6] : memref<80x32xf32, #tpu.memory_space<vmem>>, vector<16x8xf32>
    %c0_7 = arith.constant 0 : index
    %c0_8 = arith.constant 0 : index
    %5 = vector.load %arg3[%c0_7, %c0_8] : memref<56x32xf32, #tpu.memory_space<vmem>>, vector<8x16xf32>
    %c8 = arith.constant 8 : index
    %c0_9 = arith.constant 0 : index
    %6 = vector.load %arg3[%c8, %c0_9] : memref<56x32xf32, #tpu.memory_space<vmem>>, vector<16x32xf32>
    %c24 = arith.constant 24 : index
    %c0_10 = arith.constant 0 : index
    %7 = vector.load %arg3[%c24, %c0_10] : memref<56x32xf32, #tpu.memory_space<vmem>>, vector<32x32xf32>
    %c0_11 = arith.constant 0 : index
    %c0_12 = arith.constant 0 : index
    %8 = vector.load %arg4[%c0_11, %c0_12] : memref<8x32xf32, #tpu.memory_space<vmem>>, vector<1x32xf32>
    %c1 = arith.constant 1 : index
    %c0_13 = arith.constant 0 : index
    %9 = vector.load %arg4[%c1, %c0_13] : memref<8x32xf32, #tpu.memory_space<vmem>>, vector<1x16xf32>
    %c2 = arith.constant 2 : index
    %c0_14 = arith.constant 0 : index
    %10 = vector.load %arg4[%c2, %c0_14] : memref<8x32xf32, #tpu.memory_space<vmem>>, vector<1x8xf32>
    %c3 = arith.constant 3 : index
    %c0_15 = arith.constant 0 : index
    %11 = vector.load %arg4[%c3, %c0_15] : memref<8x32xf32, #tpu.memory_space<vmem>>, vector<1x16xf32>
    %c4 = arith.constant 4 : index
    %c0_16 = arith.constant 0 : index
    %12 = vector.load %arg4[%c4, %c0_16] : memref<8x32xf32, #tpu.memory_space<vmem>>, vector<1x32xf32>
    %c5 = arith.constant 5 : index
    %c0_17 = arith.constant 0 : index
    %13 = vector.load %arg4[%c5, %c0_17] : memref<8x32xf32, #tpu.memory_space<vmem>>, vector<1x32xf32>
    %c0_18 = arith.constant 0 : index
    %c0_19 = arith.constant 0 : index
    %14 = vector.load %arg5[%c0_18, %c0_19] : memref<24x16xf32, #tpu.memory_space<vmem>>, vector<16x8xf32>
    %c16 = arith.constant 16 : index
    %c0_20 = arith.constant 0 : index
    %15 = vector.load %arg5[%c16, %c0_20] : memref<24x16xf32, #tpu.memory_space<vmem>>, vector<8x16xf32>
    %cst = arith.constant dense<0.000000e+00> : vector<128x32xf32>
    %16 = tpu.matmul %0, %2, %cst {dimension_numbers = #tpu.dot_dimension_numbers<[1], [0], [0], [1], [0, 0, 1, 1], [], []>} : vector<128x32xf32>, vector<32x32xf32>, vector<128x32xf32> -> vector<128x32xf32>
    %17 = vector.broadcast %8 : vector<1x32xf32> to vector<128x32xf32>
    %18 = arith.addf %16, %17 : vector<128x32xf32>
    %cst_21 = arith.constant 0.000000e+00 : f32
    %19 = vector.broadcast %cst_21 : f32 to vector<128x32xf32>
    %20 = arith.maximumf %18, %19 : vector<128x32xf32>
    %cst_22 = arith.constant dense<0.000000e+00> : vector<128x16xf32>
    %21 = tpu.matmul %20, %3, %cst_22 {dimension_numbers = #tpu.dot_dimension_numbers<[1], [0], [0], [1], [0, 0, 1, 1], [], []>} : vector<128x32xf32>, vector<32x16xf32>, vector<128x16xf32> -> vector<128x16xf32>
    %22 = vector.broadcast %9 : vector<1x16xf32> to vector<128x16xf32>
    %23 = arith.addf %21, %22 : vector<128x16xf32>
    %cst_23 = arith.constant 0.000000e+00 : f32
    %24 = vector.broadcast %cst_23 : f32 to vector<128x16xf32>
    %25 = arith.maximumf %23, %24 : vector<128x16xf32>
    %cst_24 = arith.constant dense<0.000000e+00> : vector<128x8xf32>
    %26 = tpu.matmul %25, %4, %cst_24 {dimension_numbers = #tpu.dot_dimension_numbers<[1], [0], [0], [1], [0, 0, 1, 1], [], []>} : vector<128x16xf32>, vector<16x8xf32>, vector<128x8xf32> -> vector<128x8xf32>
    %27 = vector.broadcast %10 : vector<1x8xf32> to vector<128x8xf32>
    %28 = arith.addf %26, %27 : vector<128x8xf32>
    %29 = arith.mulf %28, %28 : vector<128x8xf32>
    %cst_25 = arith.constant dense<0.000000e+00> : vector<128xf32>
    %30 = vector.multi_reduction <add>, %29, %cst_25 [1] : vector<128x8xf32> to vector<128xf32>
    %31 = vector.shape_cast %30 : vector<128xf32> to vector<128x1xf32>
    %32 = arith.mulf %15, %15 : vector<8x16xf32>
    %cst_26 = arith.constant dense<0.000000e+00> : vector<16xf32>
    %33 = vector.multi_reduction <add>, %32, %cst_26 [0] : vector<8x16xf32> to vector<16xf32>
    %34 = vector.shape_cast %33 : vector<16xf32> to vector<1x16xf32>
    %cst_27 = arith.constant dense<0.000000e+00> : vector<128x16xf32>
    %35 = tpu.matmul %28, %15, %cst_27 {dimension_numbers = #tpu.dot_dimension_numbers<[1], [0], [0], [1], [0, 0, 1, 1], [], []>} : vector<128x8xf32>, vector<8x16xf32>, vector<128x16xf32> -> vector<128x16xf32>
    %36 = vector.broadcast %31 : vector<128x1xf32> to vector<128x16xf32>
    %37 = vector.broadcast %34 : vector<1x16xf32> to vector<128x16xf32>
    %38 = arith.addf %36, %37 : vector<128x16xf32>
    %cst_28 = arith.constant 2.000000e+00 : f32
    %39 = vector.broadcast %cst_28 : f32 to vector<128x16xf32>
    %40 = arith.mulf %39, %35 : vector<128x16xf32>
    %41 = arith.subf %38, %40 : vector<128x16xf32>
    %cst_29 = arith.constant dense<0x7F800000> : vector<128xf32>
    %42 = vector.multi_reduction <minimumf>, %41, %cst_29 [1] : vector<128x16xf32> to vector<128xf32>
    %43 = vector.shape_cast %42 : vector<128xf32> to vector<128x1xf32>
    %44 = tpu.iota {dimensions = array<i32: 1>} : vector<128x16xi32>
    %45 = vector.broadcast %43 : vector<128x1xf32> to vector<128x16xf32>
    %46 = arith.cmpf ole, %41, %45 : vector<128x16xf32>
    %c16_i32 = arith.constant 16 : i32
    %47 = vector.broadcast %c16_i32 : i32 to vector<128x16xi32>
    %48 = arith.select %46, %44, %47 : vector<128x16xi1>, vector<128x16xi32>
    %cst_30 = arith.constant dense<2147483647> : vector<128xi32>
    %49 = vector.multi_reduction <minsi>, %48, %cst_30 [1] : vector<128x16xi32> to vector<128xi32>
    %50 = vector.shape_cast %49 : vector<128xi32> to vector<128x1xi32>
    %51 = vector.broadcast %50 : vector<128x1xi32> to vector<128x16xi32>
    %52 = arith.cmpi eq, %44, %51 : vector<128x16xi32>
    %53 = arith.extui %52 : vector<128x16xi1> to vector<128x16xi32>
    %54 = arith.sitofp %53 : vector<128x16xi32> to vector<128x16xf32>
    %cst_31 = arith.constant dense<0.000000e+00> : vector<128x8xf32>
    %55 = tpu.matmul %54, %14, %cst_31 {dimension_numbers = #tpu.dot_dimension_numbers<[1], [0], [0], [1], [0, 0, 1, 1], [], []>} : vector<128x16xf32>, vector<16x8xf32>, vector<128x8xf32> -> vector<128x8xf32>
    %cst_32 = arith.constant dense<0.000000e+00> : vector<128x16xf32>
    %56 = tpu.matmul %55, %5, %cst_32 {dimension_numbers = #tpu.dot_dimension_numbers<[1], [0], [0], [1], [0, 0, 1, 1], [], []>} : vector<128x8xf32>, vector<8x16xf32>, vector<128x16xf32> -> vector<128x16xf32>
    %57 = vector.broadcast %11 : vector<1x16xf32> to vector<128x16xf32>
    %58 = arith.addf %56, %57 : vector<128x16xf32>
    %cst_33 = arith.constant 0.000000e+00 : f32
    %59 = vector.broadcast %cst_33 : f32 to vector<128x16xf32>
    %60 = arith.maximumf %58, %59 : vector<128x16xf32>
    %cst_34 = arith.constant dense<0.000000e+00> : vector<128x32xf32>
    %61 = tpu.matmul %60, %6, %cst_34 {dimension_numbers = #tpu.dot_dimension_numbers<[1], [0], [0], [1], [0, 0, 1, 1], [], []>} : vector<128x16xf32>, vector<16x32xf32>, vector<128x32xf32> -> vector<128x32xf32>
    %62 = vector.broadcast %12 : vector<1x32xf32> to vector<128x32xf32>
    %63 = arith.addf %61, %62 : vector<128x32xf32>
    %cst_35 = arith.constant 0.000000e+00 : f32
    %64 = vector.broadcast %cst_35 : f32 to vector<128x32xf32>
    %65 = arith.maximumf %63, %64 : vector<128x32xf32>
    %cst_36 = arith.constant dense<0.000000e+00> : vector<128x32xf32>
    %66 = tpu.matmul %65, %7, %cst_36 {dimension_numbers = #tpu.dot_dimension_numbers<[1], [0], [0], [1], [0, 0, 1, 1], [], []>} : vector<128x32xf32>, vector<32x32xf32>, vector<128x32xf32> -> vector<128x32xf32>
    %67 = vector.broadcast %13 : vector<1x32xf32> to vector<128x32xf32>
    %68 = arith.addf %66, %67 : vector<128x32xf32>
    %69 = arith.sitofp %50 : vector<128x1xi32> to vector<128x1xf32>
    %cst_37 = arith.constant 0.000000e+00 : f32
    %70 = vector.broadcast %cst_37 : f32 to vector<128x95xf32>
    %71 = tpu.concatenate %68, %69, %70 in 1 : vector<128x32xf32>, vector<128x1xf32>, vector<128x95xf32> -> vector<128x128xf32>
    %c0_38 = arith.constant 0 : index
    %c0_39 = arith.constant 0 : index
    %72 = vector.load %arg6[%c0_38, %c0_39] : memref<128x128xf32, #tpu.memory_space<vmem>>, vector<128x128xf32>
    tpu.vector_store %arg6[%c0_38, %c0_39], %71 {strides = array<i32>} : memref<128x128xf32, #tpu.memory_space<vmem>>, vector<128x128xf32>,
    %73 = arith.subf %55, %28 : vector<128x8xf32>
    %74 = arith.mulf %73, %73 : vector<128x8xf32>
    %cst_40 = arith.constant dense<0.000000e+00> : vector<128xf32>
    %75 = vector.multi_reduction <add>, %74, %cst_40 [1] : vector<128x8xf32> to vector<128xf32>
    %76 = vector.shape_cast %75 : vector<128xf32> to vector<128x1xf32>
    %cst_41 = arith.constant dense<0.000000e+00> : vector<1xf32>
    %77 = vector.multi_reduction <add>, %76, %cst_41 [0] : vector<128x1xf32> to vector<1xf32>
    %78 = vector.shape_cast %77 : vector<1xf32> to vector<1x1xf32>
    %79 = arith.mulf %55, %55 : vector<128x8xf32>
    %cst_42 = arith.constant dense<0.000000e+00> : vector<128xf32>
    %80 = vector.multi_reduction <add>, %79, %cst_42 [1] : vector<128x8xf32> to vector<128xf32>
    %81 = vector.shape_cast %80 : vector<128xf32> to vector<128x1xf32>
    %cst_43 = arith.constant 9.99999993E-9 : f32
    %82 = vector.broadcast %cst_43 : f32 to vector<128x1xf32>
    %83 = arith.addf %81, %82 : vector<128x1xf32>
    %84 = math.rsqrt %83 : vector<128x1xf32>
    %85 = vector.broadcast %84 : vector<128x1xf32> to vector<128x8xf32>
    %86 = arith.mulf %55, %85 : vector<128x8xf32>
    %cst_44 = arith.constant dense<0.000000e+00> : vector<16xf32>
    %87 = vector.multi_reduction <add>, %54, %cst_44 [0] : vector<128x16xf32> to vector<16xf32>
    %88 = vector.shape_cast %87 : vector<16xf32> to vector<1x16xf32>
    %89 = tpu.iota {dimensions = array<i32: 1>} : vector<128x4xi32>
    %90 = arith.fptosi %1 : vector<128x1xf32> to vector<128x1xi32>
    %91 = vector.broadcast %90 : vector<128x1xi32> to vector<128x4xi32>
    %92 = arith.cmpi eq, %91, %89 : vector<128x4xi32>
    %93 = arith.extui %92 : vector<128x4xi1> to vector<128x4xi32>
    %94 = arith.sitofp %93 : vector<128x4xi32> to vector<128x4xf32>
    %cst_45 = arith.constant dense<0.000000e+00> : vector<4xf32>
    %95 = vector.multi_reduction <add>, %94, %cst_45 [0] : vector<128x4xf32> to vector<4xf32>
    %96 = vector.shape_cast %95 : vector<4xf32> to vector<1x4xf32>
    %cst_46 = arith.constant dense<0.000000e+00> : vector<4x8xf32>
    %97 = tpu.matmul %94, %86, %cst_46 {dimension_numbers = #tpu.dot_dimension_numbers<[0], [0], [1], [1], [0, 1, 1, 1], [], []>} : vector<128x4xf32>, vector<128x8xf32>, vector<4x8xf32> -> vector<4x8xf32>
    %cst_47 = arith.constant 0.000000e+00 : f32
    %98 = vector.broadcast %cst_47 : f32 to vector<1x112xf32>
    %99 = tpu.concatenate %88, %98 in 1 : vector<1x16xf32>, vector<1x112xf32> -> vector<1x128xf32>
    %cst_48 = arith.constant 0.000000e+00 : f32
    %100 = vector.broadcast %cst_48 : f32 to vector<1x124xf32>
    %101 = tpu.concatenate %96, %100 in 1 : vector<1x4xf32>, vector<1x124xf32> -> vector<1x128xf32>
    %cst_49 = arith.constant 0.000000e+00 : f32
    %102 = vector.broadcast %cst_49 : f32 to vector<1x127xf32>
    %103 = tpu.concatenate %78, %102 in 1 : vector<1x1xf32>, vector<1x127xf32> -> vector<1x128xf32>
    %cst_50 = arith.constant 0.000000e+00 : f32
    %104 = vector.broadcast %cst_50 : f32 to vector<4x120xf32>
    %105 = tpu.concatenate %97, %104 in 1 : vector<4x8xf32>, vector<4x120xf32> -> vector<4x128xf32>
    %cst_51 = arith.constant 0.000000e+00 : f32
    %106 = vector.broadcast %cst_51 : f32 to vector<1x128xf32>
    %107 = tpu.concatenate %99, %101, %103, %105, %106 in 0 : vector<1x128xf32>, vector<1x128xf32>, vector<1x128xf32>, vector<4x128xf32>, vector<1x128xf32> -> vector<8x128xf32>
    %c0_52 = arith.constant 0 : index
    %c0_53 = arith.constant 0 : index
    %108 = vector.load %arg7[%c0_52, %c0_53] : memref<8x128xf32, #tpu.memory_space<vmem>>, vector<8x128xf32>
    tpu.vector_store %arg7[%c0_52, %c0_53], %107 {strides = array<i32>} : memref<8x128xf32, #tpu.memory_space<vmem>>, vector<8x128xf32>,
    return
  }
  func.func @transform_0(%arg0: i32) -> (i32, i32) {
    %c0_i32 = arith.constant 0 : i32
    %c0_i32_0 = arith.constant 0 : i32
    return %arg0, %c0_i32 : i32, i32
  }
  func.func @transform_1(%arg0: i32) -> (i32, i32) {
    %c0_i32 = arith.constant 0 : i32
    %c0_i32_0 = arith.constant 0 : i32
    %c0_i32_1 = arith.constant 0 : i32
    return %c0_i32, %c0_i32_0 : i32, i32
  }
  func.func @transform_2(%arg0: i32) -> (i32, i32) {
    %c0_i32 = arith.constant 0 : i32
    %c0_i32_0 = arith.constant 0 : i32
    %c0_i32_1 = arith.constant 0 : i32
    return %c0_i32, %c0_i32_0 : i32, i32
  }
  func.func @transform_3(%arg0: i32) -> (i32, i32) {
    %c0_i32 = arith.constant 0 : i32
    %c0_i32_0 = arith.constant 0 : i32
    %c0_i32_1 = arith.constant 0 : i32
    return %c0_i32, %c0_i32_0 : i32, i32
  }
  func.func @transform_4(%arg0: i32) -> (i32, i32) {
    %c0_i32 = arith.constant 0 : i32
    %c0_i32_0 = arith.constant 0 : i32
    %c0_i32_1 = arith.constant 0 : i32
    return %c0_i32, %c0_i32_0 : i32, i32
  }
  func.func @transform_5(%arg0: i32) -> (i32, i32) {
    %c0_i32 = arith.constant 0 : i32
    %c0_i32_0 = arith.constant 0 : i32
    return %arg0, %c0_i32 : i32, i32
  }
  func.func @transform_6(%arg0: i32) -> (i32, i32) {
    %c0_i32 = arith.constant 0 : i32
    %c0_i32_0 = arith.constant 0 : i32
    return %arg0, %c0_i32 : i32, i32
  }
}

</mosaic_0001>

<bundles_post_ra>
// kernel: svqvae_forward.1
= control target key start
LH: loop header
LB: loop body
LE: loop exit
PB: predicated region body
PF: predicated region fallthrough
CT: control target
= control target key end

     0   :  { %s3921_s21 = smov 0   ;;  %s5214_s0 = inlined_call_operand.vmem [shape: f32[256,64], index: 0, kind: input, shape index: {}]   ;;  %s5215_s1 = inlined_call_operand.vmem [shape: f32[80,32], index: 1, kind: input, shape index: {}]   ;;  %s5216_s2 = inlined_call_operand.vmem [shape: f32[56,32], index: 2, kind: input, shape index: {}]   ;;  %s5217_s3 = inlined_call_operand.vmem [shape: f32[8,32], index: 3, kind: input, shape index: {}]   ;;  %s5218_s4 = inlined_call_operand.vmem [shape: f32[24,16], index: 4, kind: input, shape index: {}]   ;;  %s5219_s5 = inlined_call_operand.vmem [shape: f32[256,128], index: 5, kind: output, shape index: {0}]   ;;  %s5220_s6 = inlined_call_operand.vmem [shape: f32[16,128], index: 6, kind: output, shape index: {1}]  }
   0x1 LB: > { %s3927_s22 = sadd.s32 4294967295, %s3880_s21   ;;  %p3114_p0 = scmp.ge.s32.totalorder %s3880_s21, 1  ;;  %s3880_s21 = sphi %s3921_s21, %s17_s21  }
   0x2   : > { %p216_p1 = scmp.lt.s32.totalorder %s3880_s21, 3 }
   0x4   : > { %p217_p2 = pnand %p3114_p0, %p216_p1 }
   0x6   : > { %220 = sbr.rel (%p217_p2) target bundleno = 2232 (0x8b8), region = 40 }
   0xd   : > { %v282_v0 = vld [vmem:[%s5215_s1] sm:$0xff]  ;;  %v283_v1 = vld [vmem:[%s5215_s1 + $0x8] sm:$0xff]  ;;  %v284_v2 = vld [vmem:[%s5215_s1 + $0x10] sm:$0xff]  ;;  %s3115_s29 = sshll.u32 %s3927_s22, 4  ;;  %vm312_vm0 = vcmask 261120   ;;  %vm739_vm1 = vcmask 130048  }
   0xe   : > { %v3720_v3 = vpack.c.bf16 %v283_v1, %v282_v0  ;;  %v285_v4 = vld [vmem:[%s5215_s1 + $0x18] sm:$0xff]  ;;  %p251_p3 = scmp.lt.s32.totalorder %s3115_s29, 31  ;;  %v286_v5 = vld [vmem:[%s5215_s1 + $0x20] sm:$0xff]  ;;  %v287_v6 = vld [vmem:[%s5215_s1 + $0x28] sm:$0xff]  ;;  %vm949_vm2 = vcmask 64512   ;;  %p262_p4 = scmp.lt.s32.totalorder %s3927_s22, 1 }
   0xf   : > { %v3724_v7 = vpack.c.bf16 %v285_v4, %v284_v2  ;;  %v3728_v8 = vpack.c.bf16 %v287_v6, %v286_v5  ;;  %v288_v25 = vld [vmem:[%s5215_s1 + $0x30] sm:$0xff]  ;;  %v289_v26 = vld [vmem:[%s5215_s1 + $0x38] sm:$0xff]  ;;  %v290_v28 = vld [vmem:[%s5215_s1 + $0x40] sm:$0xff] }
  0x10   : > { %3721 = vmatprep.subr.bf16.mxu0 %v3720_v3  ;;  %s5235_s29 = smov (!%p251_p3, %s3115_s29), 31  ;;  %v3732_v27 = vpack.c.bf16 %v289_v26, %v288_v25  ;;  %v291_v29 = vld [vmem:[%s5215_s1 + $0x48] sm:$0xff]  ;;  %v3120_v31 = vld [vmem:[%s5217_s3] ss:$0 sm:$0xff]  ;;  %s5237_s22 = smov (!%p262_p4, %s3927_s22), 1 }
  0x11   : > { %3723 = vmatpush3.bf16.msra.mxu0 %v3720_v3  ;;  %3729 = vmatprep.subr.bf16.mxu1 %v3728_v8  ;;  %s3116_s12 = sshll.u32 %s5235_s29, 3  ;;  %v3736_v30 = vpack.c.bf16 %v291_v29, %v290_v28  ;;  %s3119_s14 = sshll.u32 %s5237_s22, 3 }
  0x12   : > { %3725 = vmatprep.subr.bf16.mxu0 %v3724_v7  ;;  %3731 = vmatpush3.bf16.msra.mxu1 %v3728_v8  ;;  %s3958_s15 = scalar_lea.vmem %s5214_s0, %s3116_s12  ;;  %s265_s18 = scalar_lea.vmem %s5220_s6, %s3119_s14 }
  0x13   : > { %v266_v9 = vld [vmem:[%s3958_s15] sm:$0xff]  ;;  %v267_v10 = vld [vmem:[%s3958_s15 + $0x8] sm:$0xff]  ;;  %v268_v11 = vld [vmem:[%s3958_s15 + $0x10] sm:$0xff]  ;;  %3733 = vmatprep.subr.bf16.mxu1 %v3732_v27  ;;  %s5131_s23 = scalar_lea.vmem %s5219_s5, %s3116_s12 }
  0x14   : > { %3461 = vmatprep.mubr.msk.f32.mxu0 %vm312_vm0, %v266_v9  ;;  %v269_v12 = vld [vmem:[%s3958_s15 + $0x18] sm:$0xff]  ;;  %v270_v13 = vld [vmem:[%s3958_s15 + $0x20] sm:$0xff]  ;;  %v271_v14 = vld [vmem:[%s3958_s15 + $0x28] sm:$0xff] }
  0x15   : > { %3727 = vmatpush3.bf16.msra.mxu0 %v3724_v7  ;;  %v272_v15 = vld [vmem:[%s3958_s15 + $0x30] sm:$0xff]  ;;  %v273_v16 = vld [vmem:[%s3958_s15 + $0x38] sm:$0xff]  ;;  %v274_v17 = vld [vmem:[%s3958_s15 + $0x40] sm:$0xff] }
  0x16   : > { %v275_v18 = vld [vmem:[%s3958_s15 + $0x48] sm:$0xff]  ;;  %v276_v19 = vld [vmem:[%s3958_s15 + $0x50] sm:$0xff]  ;;  %v277_v20 = vld [vmem:[%s3958_s15 + $0x58] sm:$0xff]  ;;  %3735 = vmatpush3.bf16.msra.mxu1 %v3732_v27  ;;  %3737 = vmatprep.subr.bf16.mxu0 %v3736_v30 }
  0x17   : > { %v278_v21 = vld [vmem:[%s3958_s15 + $0x60] sm:$0xff]  ;;  %v279_v22 = vld [vmem:[%s3958_s15 + $0x68] sm:$0xff]  ;;  %v280_v23 = vld [vmem:[%s3958_s15 + $0x70] sm:$0xff] }
  0x18   : > { %3462 = vmatmul.mubr.msk.f32.vlgmr.msra.gmra.mrb[0].mxu0 %vm312_vm0, %v267_v10  ;;  %v281_v24 = vld [vmem:[%s3958_s15 + $0x78] sm:$0xff] }
  0x19   : > { %3464 = vmatprep.mubr.msk.f32.mxu0 %vm312_vm0, %v268_v11  ;;  %3739 = vmatpush3.bf16.msra.mxu0 %v3736_v30 }
  0x1c   : > { %3465 = vmatmul.mubr.msk.f32.gmra.mrb[2].mxu0 %vm312_vm0, %v269_v12 }
  0x1d   : > { %3467 = vmatprep.mubr.msk.f32.mxu0 %vm312_vm0, %v270_v13 }
  0x20   : > { %3468 = vmatmul.mubr.msk.f32.gmra.mrb[4].mxu0 %vm312_vm0, %v271_v14 }
  0x21   : > { %3470 = vmatprep.mubr.msk.f32.mxu0 %vm312_vm0, %v272_v15 }
  0x24   : > { %3471 = vmatmul.mubr.msk.f32.gmra.mrb[6].mxu0 %vm312_vm0, %v273_v16  ;;  %v4026_v16 = vld [vmem:[%s5218_s4 + $0x10] sm:$0xff] }
  0x25   : > { %3473 = vmatprep.mubr.msk.f32.mxu0 %vm312_vm0, %v274_v17  ;;  %3545 = vmatprep.subr.mxu1 %v4026_v16  ;;  %v3137_v17 = vld [vmem:[%s5217_s3 + $0x1] ss:$0 sm:$0xff] }
  0x28   : > { %3474 = vmatmul.mubr.msk.f32.gmra.mrb[8].mxu0 %vm312_vm0, %v275_v18 }
  0x29   : > { %3476 = vmatprep.mubr.msk.f32.mxu0 %vm312_vm0, %v276_v19 }
  0x2c   : > { %3477 = vmatmul.mubr.msk.f32.gmra.mrb[10].mxu0 %vm312_vm0, %v277_v20 }
  0x2d   : > { %3479 = vmatprep.mubr.msk.f32.mxu0 %vm312_vm0, %v278_v21 }
  0x30   : > { %3480 = vmatmul.mubr.msk.f32.gmra.mrb[12].mxu0 %vm312_vm0, %v279_v22 }
  0x31   : > { %3482 = vmatprep.mubr.msk.f32.mxu0 %vm312_vm0, %v280_v23 }
  0x34   : > { %3483 = vmatmul.mubr.msk.f32.gmra.mrb[14].mxu0 %vm312_vm0, %v281_v24 }
  0xeb   : > { %v3463_v32 = vpop.f32.mrb[0].mxu0 }
  0xec   : > { %v433_v33 = vadd.f32 %v3463_v32, %v3120_v31  ;;  %v427_v34 = vpop.f32.mrb[1].mxu0 }
  0xed   : > { %v428_v35 = vadd.f32 %v3120_v31, %v427_v34 }
  0xee   : > { %v507_v38 = vmax.f32 %v433_v33, 0.0 }
  0xef   : > { %v506_v36 = vmax.f32 %v428_v35, 0.0  ;;  %v3466_v37 = vpop.f32.mrb[2].mxu0 }
  0xf0   : > { %v443_v39 = vadd.f32 %v3466_v37, %v3120_v31  ;;  %v437_v40 = vpop.f32.mrb[3].mxu0 }
  0xf1   : > { %v438_v41 = vadd.f32 %v3120_v31, %v437_v40  ;;  %3493 = vmatprep.mubr.msk.f32.mxu1 %vm312_vm0, %v506_v36 }
  0xf2   : > { %3494 = vmatmul.mubr.msk.f32.vlgmr.msra.gmra.mrb[0].mxu1 %vm312_vm0, %v507_v38  ;;  %v509_v44 = vmax.f32 %v443_v39, 0.0 }
  0xf3   : > { %v508_v42 = vmax.f32 %v438_v41, 0.0  ;;  %v3469_v43 = vpop.f32.mrb[4].mxu0  ;;  %3546 = vmatpush3.msra.mxu1 %v4026_v16 }
  0xf4   : > { %v453_v45 = vadd.f32 %v3469_v43, %v3120_v31  ;;  %v447_v46 = vpop.f32.mrb[5].mxu0 }
  0xf5   : > { %v448_v47 = vadd.f32 %v3120_v31, %v447_v46  ;;  %3496 = vmatprep.mubr.msk.f32.mxu1 %vm312_vm0, %v508_v42 }
  0xf6   : > { %3497 = vmatmul.mubr.msk.f32.gmra.mrb[2].mxu1 %vm312_vm0, %v509_v44  ;;  %v511_v50 = vmax.f32 %v453_v45, 0.0 }
  0xf7   : > { %v510_v48 = vmax.f32 %v448_v47, 0.0  ;;  %v3472_v49 = vpop.f32.mrb[6].mxu0 }
  0xf8   : > { %v463_v51 = vadd.f32 %v3472_v49, %v3120_v31  ;;  %v457_v52 = vpop.f32.mrb[7].mxu0 }
  0xf9   : > { %v458_v53 = vadd.f32 %v3120_v31, %v457_v52  ;;  %3499 = vmatprep.mubr.msk.f32.mxu1 %vm312_vm0, %v510_v48 }
  0xfa   : > { %3500 = vmatmul.mubr.msk.f32.gmra.mrb[4].mxu1 %vm312_vm0, %v511_v50  ;;  %v513_v56 = vmax.f32 %v463_v51, 0.0 }
  0xfb   : > { %v512_v54 = vmax.f32 %v458_v53, 0.0  ;;  %v3475_v55 = vpop.f32.mrb[8].mxu0 }
  0xfc   : > { %v473_v57 = vadd.f32 %v3475_v55, %v3120_v31  ;;  %v467_v58 = vpop.f32.mrb[9].mxu0 }
  0xfd   : > { %v468_v59 = vadd.f32 %v3120_v31, %v467_v58  ;;  %3502 = vmatprep.mubr.msk.f32.mxu1 %vm312_vm0, %v512_v54 }
  0xfe   : > { %3503 = vmatmul.mubr.msk.f32.gmra.mrb[6].mxu1 %vm312_vm0, %v513_v56  ;;  %v515_v62 = vmax.f32 %v473_v57, 0.0 }
  0xff   : > { %v514_v60 = vmax.f32 %v468_v59, 0.0  ;;  %v3478_v61 = vpop.f32.mrb[10].mxu0 }
 0x100   : > { %v483_v63 = vadd.f32 %v3478_v61, %v3120_v31  ;;  %v477_v0 = vpop.f32.mrb[11].mxu0 }
 0x101   : > { %v478_v1 = vadd.f32 %v3120_v31, %v477_v0  ;;  %3505 = vmatprep.mubr.msk.f32.mxu1 %vm312_vm0, %v514_v60 }
 0x102   : > { %3506 = vmatmul.mubr.msk.f32.gmra.mrb[8].mxu1 %vm312_vm0, %v515_v62  ;;  %v517_v4 = vmax.f32 %v483_v63, 0.0 }
 0x103   : > { %v516_v2 = vmax.f32 %v478_v1, 0.0  ;;  %v3481_v3 = vpop.f32.mrb[12].mxu0 }
 0x104   : > { %v493_v5 = vadd.f32 %v3481_v3, %v3120_v31  ;;  %v487_v6 = vpop.f32.mrb[13].mxu0 }
 0x105   : > { %v488_v7 = vadd.f32 %v3120_v31, %v487_v6  ;;  %3508 = vmatprep.mubr.msk.f32.mxu1 %vm312_vm0, %v516_v2  ;;  %v4052_v2 = vld [vmem:[%s5217_s3 + $0x2] ss:$0 sm:$0xff] }
 0x106   : > { %3509 = vmatmul.mubr.msk.f32.gmra.mrb[10].mxu1 %vm312_vm0, %v517_v4  ;;  %v519_v10 = vmax.f32 %v493_v5, 0.0 }
 0x107   : > { %v518_v8 = vmax.f32 %v488_v7, 0.0  ;;  %v3484_v9 = vpop.f32.mrb[14].mxu0 }
 0x108   : > { %v503_v11 = vadd.f32 %v3484_v9, %v3120_v31  ;;  %v497_v12 = vpop.f32.mrb[15].mxu0 }
 0x109   : > { %v498_v13 = vadd.f32 %v3120_v31, %v497_v12  ;;  %3511 = vmatprep.mubr.msk.f32.mxu1 %vm312_vm0, %v518_v8 }
 0x10a   : > { %3512 = vmatmul.mubr.msk.f32.gmra.mrb[12].mxu1 %vm312_vm0, %v519_v10  ;;  %v521_v15 = vmax.f32 %v503_v11, 0.0 }
 0x10b   : > { %v520_v14 = vmax.f32 %v498_v13, 0.0 }
 0x10d   : > { %3514 = vmatprep.mubr.msk.f32.mxu1 %vm312_vm0, %v520_v14 }
 0x10e   : > { %3515 = vmatmul.mubr.msk.f32.gmra.mrb[14].mxu1 %vm312_vm0, %v521_v15 }
 0x1c5   : > { %v3495_v18 = vpop.f32.mrb[0].mxu1 }
 0x1c6   : > { %v646_v19 = vadd.f32 %v3495_v18, %v3137_v17  ;;  %v640_v20 = vpop.f32.mrb[1].mxu1 }
 0x1c7   : > { %v641_v21 = vadd.f32 %v3137_v17, %v640_v20 }
 0x1c8   : > { %v720_v24 = vmax.f32 %v646_v19, 0.0 }
 0x1c9   : > { %v719_v22 = vmax.f32 %v641_v21, 0.0  ;;  %v3498_v23 = vpop.f32.mrb[2].mxu1 }
 0x1ca   : > { %v656_v25 = vadd.f32 %v3498_v23, %v3137_v17  ;;  %v650_v26 = vpop.f32.mrb[3].mxu1 }
 0x1cb   : > { %v651_v27 = vadd.f32 %v3137_v17, %v650_v26  ;;  %3521 = vmatprep.mubr.msk.f32.mxu0 %vm739_vm1, %v719_v22 }
 0x1cc   : > { %3522 = vmatmul.mubr.msk.f32.vlgmr.msra.gmra.mrb[16].mxu0 %vm739_vm1, %v720_v24  ;;  %v722_v30 = vmax.f32 %v656_v25, 0.0 }
 0x1cd   : > { %v721_v28 = vmax.f32 %v651_v27, 0.0  ;;  %v3501_v29 = vpop.f32.mrb[4].mxu1 }
 0x1ce   : > { %v666_v31 = vadd.f32 %v3501_v29, %v3137_v17  ;;  %v660_v32 = vpop.f32.mrb[5].mxu1 }
 0x1cf   : > { %v661_v33 = vadd.f32 %v3137_v17, %v660_v32  ;;  %3524 = vmatprep.mubr.msk.f32.mxu0 %vm739_vm1, %v721_v28 }
 0x1d0   : > { %3525 = vmatmul.mubr.msk.f32.gmra.mrb[18].mxu0 %vm739_vm1, %v722_v30  ;;  %v724_v36 = vmax.f32 %v666_v31, 0.0 }
 0x1d1   : > { %v723_v34 = vmax.f32 %v661_v33, 0.0  ;;  %v3504_v35 = vpop.f32.mrb[6].mxu1 }
 0x1d2   : > { %v676_v37 = vadd.f32 %v3504_v35, %v3137_v17  ;;  %v670_v38 = vpop.f32.mrb[7].mxu1 }
 0x1d3   : > { %v671_v39 = vadd.f32 %v3137_v17, %v670_v38  ;;  %3527 = vmatprep.mubr.msk.f32.mxu0 %vm739_vm1, %v723_v34 }
 0x1d4   : > { %3528 = vmatmul.mubr.msk.f32.gmra.mrb[20].mxu0 %vm739_vm1, %v724_v36  ;;  %v726_v42 = vmax.f32 %v676_v37, 0.0 }
 0x1d5   : > { %v725_v40 = vmax.f32 %v671_v39, 0.0  ;;  %v3507_v41 = vpop.f32.mrb[8].mxu1 }
 0x1d6   : > { %v686_v43 = vadd.f32 %v3507_v41, %v3137_v17  ;;  %v680_v44 = vpop.f32.mrb[9].mxu1 }
 0x1d7   : > { %v681_v45 = vadd.f32 %v3137_v17, %v680_v44  ;;  %3530 = vmatprep.mubr.msk.f32.mxu0 %vm739_vm1, %v725_v40 }
 0x1d8   : > { %3531 = vmatmul.mubr.msk.f32.gmra.mrb[22].mxu0 %vm739_vm1, %v726_v42  ;;  %v728_v48 = vmax.f32 %v686_v43, 0.0 }
 0x1d9   : > { %v727_v46 = vmax.f32 %v681_v45, 0.0  ;;  %v3510_v47 = vpop.f32.mrb[10].mxu1 }
 0x1da   : > { %v696_v49 = vadd.f32 %v3510_v47, %v3137_v17  ;;  %v690_v50 = vpop.f32.mrb[11].mxu1 }
 0x1db   : > { %v691_v51 = vadd.f32 %v3137_v17, %v690_v50  ;;  %3533 = vmatprep.mubr.msk.f32.mxu0 %vm739_vm1, %v727_v46 }
 0x1dc   : > { %3534 = vmatmul.mubr.msk.f32.gmra.mrb[24].mxu0 %vm739_vm1, %v728_v48  ;;  %v730_v54 = vmax.f32 %v696_v49, 0.0 }
 0x1dd   : > { %v729_v52 = vmax.f32 %v691_v51, 0.0  ;;  %v3513_v53 = vpop.f32.mrb[12].mxu1 }
 0x1de   : > { %v706_v55 = vadd.f32 %v3513_v53, %v3137_v17  ;;  %v700_v56 = vpop.f32.mrb[13].mxu1 }
 0x1df   : > { %v701_v57 = vadd.f32 %v3137_v17, %v700_v56  ;;  %3536 = vmatprep.mubr.msk.f32.mxu0 %vm739_vm1, %v729_v52 }
 0x1e0   : > { %3537 = vmatmul.mubr.msk.f32.gmra.mrb[26].mxu0 %vm739_vm1, %v730_v54  ;;  %v732_v60 = vmax.f32 %v706_v55, 0.0 }
 0x1e1   : > { %v731_v58 = vmax.f32 %v701_v57, 0.0  ;;  %v3516_v59 = vpop.f32.mrb[14].mxu1 }
 0x1e2   : > { %v716_v61 = vadd.f32 %v3516_v59, %v3137_v17  ;;  %v710_v62 = vpop.f32.mrb[15].mxu1 }
 0x1e3   : > { %v711_v63 = vadd.f32 %v3137_v17, %v710_v62  ;;  %3539 = vmatprep.mubr.msk.f32.mxu0 %vm739_vm1, %v731_v58 }
 0x1e4   : > { %3540 = vmatmul.mubr.msk.f32.gmra.mrb[28].mxu0 %vm739_vm1, %v732_v60  ;;  %v734_v1 = vmax.f32 %v716_v61, 0.0 }
 0x1e5   : > { %v733_v0 = vmax.f32 %v711_v63, 0.0 }
 0x1e7   : > { %3542 = vmatprep.mubr.msk.f32.mxu0 %vm739_vm1, %v733_v0 }
 0x1e8   : > { %3543 = vmatmul.mubr.msk.f32.gmra.mrb[30].mxu0 %vm739_vm1, %v734_v1 }
 0x29f   : > { %v3523_v3 = vpop.f32.mrb[16].mxu0 }
 0x2a0   : > { %v854_v4 = vpop.f32.mrb[17].mxu0  ;;  %v4055_v5 = vadd.f32 %v3523_v3, %v4052_v2 }
 0x2a1   : > { %v4058_v6 = vadd.f32 %v4052_v2, %v854_v4  ;;  %v998_v4 = vmul.f32 %v4026_v16, %v4026_v16 }
 0x2a2   : > { %v934_v13 = vmul.f32 %v4055_v5, %v4055_v5 }
 0x2a3   : > { %v3526_v7 = vpop.f32.mrb[18].mxu0  ;;  %3547 = vmatprep.mubr.msk.f32.mxu1 %vm949_vm2, %v4058_v6  ;;  %v933_v8 = vmul.f32 %v4058_v6, %v4058_v6 }
 0x2a4   : > { %v864_v9 = vpop.f32.mrb[19].mxu0  ;;  %3548 = vmatmul.mubr.msk.f32.vlgmr.msra.gmra.mrb[16].mxu1 %vm949_vm2, %v4055_v5  ;;  %v4067_v10 = vadd.f32 %v3526_v7, %v4052_v2  ;;  %v953_v21 = vsel %vm949_vm2, %v934_v13, 0.0  ;;  %v999_v7 = vsel %vm739_vm1, %v998_v4, 0.0 }
 0x2a5   : > { %v4070_v11 = vadd.f32 %v4052_v2, %v864_v9  ;;  %v950_v12 = vsel %vm949_vm2, %v933_v8, 0.0  ;;  %v1000_v8 = vrot.slane %v999_v7, 4 }
 0x2a6   : > { %951 = vadd.xlane.f32.xlu0 %v950_v12  ;;  %v936_v22 = vmul.f32 %v4067_v10, %v4067_v10 }
 0x2a7   : > { %v3529_v14 = vpop.f32.mrb[20].mxu0  ;;  %3550 = vmatprep.mubr.msk.f32.mxu1 %vm949_vm2, %v4070_v11  ;;  %v935_v15 = vmul.f32 %v4070_v11, %v4070_v11  ;;  %v1001_v9 = vadd.f32 %v1000_v8, %v999_v7 }
 0x2a8   : > { %v4080_v17 = vadd.f32 %v3529_v14, %v4052_v2  ;;  %v874_v18 = vpop.f32.mrb[21].mxu0  ;;  %3551 = vmatmul.mubr.msk.f32.gmra.mrb[18].mxu1 %vm949_vm2, %v4067_v10  ;;  %v959_v29 = vsel %vm949_vm2, %v936_v22, 0.0 }
 0x2a9   : > { %v4085_v19 = vadd.f32 %v4052_v2, %v874_v18  ;;  %v956_v20 = vsel %vm949_vm2, %v935_v15, 0.0  ;;  %v1002_v14 = vrot.slane %v1001_v9, 2 }
 0x2aa   : > { %957 = vadd.xlane.f32.xlu1 %v956_v20  ;;  %954 = vadd.xlane.f32.xlu0 %v953_v21  ;;  %v938_v26 = vmul.f32 %v4080_v17, %v4080_v17 }
 0x2ab   : > { %v3532_v23 = vpop.f32.mrb[22].mxu0  ;;  %3553 = vmatprep.mubr.msk.f32.mxu1 %vm949_vm2, %v4085_v19  ;;  %v937_v24 = vmul.f32 %v4085_v19, %v4085_v19  ;;  %v1003_v15 = vadd.f32 %v1002_v14, %v1001_v9 }
 0x2ac   : > { %v884_v25 = vpop.f32.mrb[23].mxu0  ;;  %3554 = vmatmul.mubr.msk.f32.gmra.mrb[20].mxu1 %vm949_vm2, %v4080_v17  ;;  %v4100_v27 = vadd.f32 %v3532_v23, %v4052_v2  ;;  %v965_v34 = vsel %vm949_vm2, %v938_v26, 0.0 }
 0x2ad   : > { %v4103_v28 = vadd.f32 %v4052_v2, %v884_v25  ;;  %v962_v30 = vsel %vm949_vm2, %v937_v24, 0.0  ;;  %v1004_v21 = vrot.slane %v1003_v15, 1 }
 0x2ae   : > { %960 = vadd.xlane.f32.xlu1 %v959_v29  ;;  %963 = vadd.xlane.f32.xlu0 %v962_v30  ;;  %v940_v38 = vmul.f32 %v4100_v27, %v4100_v27 }
 0x2af   : > { %v3535_v31 = vpop.f32.mrb[24].mxu0  ;;  %3556 = vmatprep.mubr.msk.f32.mxu1 %vm949_vm2, %v4103_v28  ;;  %v939_v32 = vmul.f32 %v4103_v28, %v4103_v28  ;;  %v4185_v24 = vadd.f32 %v1004_v21, %v1003_v15 }
 0x2b0   : > { %v894_v33 = vpop.f32.mrb[25].mxu0  ;;  %3557 = vmatmul.mubr.msk.f32.gmra.mrb[22].mxu1 %vm949_vm2, %v4100_v27  ;;  %v4115_v35 = vadd.f32 %v3535_v31, %v4052_v2  ;;  %v971_v44 = vsel %vm949_vm2, %v940_v38, 0.0 }
 0x2b1   : > { %v4118_v36 = vadd.f32 %v4052_v2, %v894_v33  ;;  %v968_v37 = vsel %vm949_vm2, %v939_v32, 0.0 }
 0x2b2   : > { %966 = vadd.xlane.f32.xlu1 %v965_v34  ;;  %969 = vadd.xlane.f32.xlu0 %v968_v37  ;;  %v942_v46 = vmul.f32 %v4115_v35, %v4115_v35 }
 0x2b3   : > { %v3538_v39 = vpop.f32.mrb[26].mxu0  ;;  %3559 = vmatprep.mubr.msk.f32.mxu1 %vm949_vm2, %v4118_v36  ;;  %v941_v40 = vmul.f32 %v4118_v36, %v4118_v36 }
 0x2b4   : > { %v4128_v41 = vadd.f32 %v3538_v39, %v4052_v2  ;;  %v904_v42 = vpop.f32.mrb[27].mxu0  ;;  %3560 = vmatmul.mubr.msk.f32.gmra.mrb[24].mxu1 %vm949_vm2, %v4115_v35  ;;  %v977_v53 = vsel %vm949_vm2, %v942_v46, 0.0 }
 0x2b5   : > { %v4133_v43 = vadd.f32 %v4052_v2, %v904_v42  ;;  %v974_v45 = vsel %vm949_vm2, %v941_v40, 0.0 }
 0x2b6   : > { %972 = vadd.xlane.f32.xlu1 %v971_v44  ;;  %975 = vadd.xlane.f32.xlu0 %v974_v45  ;;  %v944_v50 = vmul.f32 %v4128_v41, %v4128_v41 }
 0x2b7   : > { %v3541_v47 = vpop.f32.mrb[28].mxu0  ;;  %3562 = vmatprep.mubr.msk.f32.mxu1 %vm949_vm2, %v4133_v43  ;;  %v943_v48 = vmul.f32 %v4133_v43, %v4133_v43 }
 0x2b8   : > { %v914_v49 = vpop.f32.mrb[29].mxu0  ;;  %3563 = vmatmul.mubr.msk.f32.gmra.mrb[26].mxu1 %vm949_vm2, %v4128_v41  ;;  %v4148_v51 = vadd.f32 %v3541_v47, %v4052_v2  ;;  %v983_v58 = vsel %vm949_vm2, %v944_v50, 0.0 }
 0x2b9   : > { %v4151_v52 = vadd.f32 %v4052_v2, %v914_v49  ;;  %v980_v54 = vsel %vm949_vm2, %v943_v48, 0.0 }
 0x2ba   : > { %978 = vadd.xlane.f32.xlu1 %v977_v53  ;;  %981 = vadd.xlane.f32.xlu0 %v980_v54  ;;  %v946_v62 = vmul.f32 %v4148_v51, %v4148_v51 }
 0x2bb   : > { %v3544_v55 = vpop.f32.mrb[30].mxu0  ;;  %3565 = vmatprep.mubr.msk.f32.mxu1 %vm949_vm2, %v4151_v52  ;;  %v945_v56 = vmul.f32 %v4151_v52, %v4151_v52 }
 0x2bc   : > { %v924_v57 = vpop.f32.mrb[31].mxu0  ;;  %3566 = vmatmul.mubr.msk.f32.gmra.mrb[28].mxu1 %vm949_vm2, %v4148_v51  ;;  %v4163_v59 = vadd.f32 %v3544_v55, %v4052_v2  ;;  %v989_v0 = vsel %vm949_vm2, %v946_v62, 0.0 }
 0x2bd   : > { %v4166_v60 = vadd.f32 %v4052_v2, %v924_v57  ;;  %v986_v61 = vsel %vm949_vm2, %v945_v56, 0.0 }
 0x2be   : > { %984 = vadd.xlane.f32.xlu1 %v983_v58  ;;  %987 = vadd.xlane.f32.xlu0 %v986_v61  ;;  %v948_v2 = vmul.f32 %v4163_v59, %v4163_v59 }
 0x2bf   : > { %3568 = vmatprep.mubr.msk.f32.mxu1 %vm949_vm2, %v4166_v60  ;;  %v947_v63 = vmul.f32 %v4166_v60, %v4166_v60 }
 0x2c0   : > { %3569 = vmatmul.mubr.msk.f32.gmra.mrb[30].mxu1 %vm949_vm2, %v4163_v59  ;;  %v995_v3 = vsel %vm949_vm2, %v948_v2, 0.0 }
 0x2c1   : > { %v992_v1 = vsel %vm949_vm2, %v947_v63, 0.0 }
 0x2c2   : > { %990 = vadd.xlane.f32.xlu1 %v989_v0  ;;  %993 = vadd.xlane.f32.xlu0 %v992_v1 }
 0x2c6   : > { %996 = vadd.xlane.f32.xlu1 %v995_v3 }
 0x333   : > { %v952_v13 = vpop.xlane.xlu0 %951 }
 0x334   : > { %v1199_v30 = vadd.f32 %v4185_v24, %v952_v13 }
 0x337   : > { %v958_v12 = vpop.xlane.xlu1 %957  ;;  %v955_v20 = vpop.xlane.xlu0 %954 }
 0x338   : > { %v1200_v26 = vadd.f32 %v4185_v24, %v955_v20  ;;  %v1201_v45 = vadd.f32 %v4185_v24, %v958_v12 }
 0x33b   : > { %v961_v18 = vpop.xlane.xlu1 %960  ;;  %v964_v23 = vpop.xlane.xlu0 %963 }
 0x33c   : > { %v1202_v39 = vadd.f32 %v4185_v24, %v961_v18  ;;  %v1203_v61 = vadd.f32 %v4185_v24, %v964_v23 }
 0x33f   : > { %v967_v22 = vpop.xlane.xlu1 %966  ;;  %v970_v33 = vpop.xlane.xlu0 %969 }
 0x340   : > { %v1204_v54 = vadd.f32 %v4185_v24, %v967_v22  ;;  %v1205_v9 = vadd.f32 %v4185_v24, %v970_v33 }
 0x343   : > { %v973_v31 = vpop.xlane.xlu1 %972  ;;  %v976_v55 = vpop.xlane.xlu0 %975 }
 0x344   : > { %v1206_v3 = vadd.f32 %v4185_v24, %v973_v31 }
 0x347   : > { %v979_v49 = vpop.xlane.xlu1 %978  ;;  %v982_v15 = vpop.xlane.xlu0 %981 }
 0x348   : > { %v1208_v22 = vadd.f32 %v4185_v24, %v979_v49 }
 0x34b   : > { %v985_v12 = vpop.xlane.xlu1 %984 }
 0x377   : > { %v3549_v25 = vpop.f32.mrb[16].mxu1 }
 0x378   : > { %v1216_v29 = vmul.f32 2.0, %v3549_v25  ;;  %v1120_v16 = vpop.f32.mrb[17].mxu1 }
 0x379   : > { %v1215_v32 = vmul.f32 2.0, %v1120_v16 }
 0x37a   : > { %v4189_v34 = vsub.f32 %v1200_v26, %v1216_v29  ;;  %v1207_v29 = vadd.f32 %v4185_v24, %v976_v55 }
 0x37b   : > { %v3552_v37 = vpop.f32.mrb[18].mxu1  ;;  %v4191_v38 = vsub.f32 %v1199_v30, %v1215_v32  ;;  %v991_v32 = vpop.xlane.xlu1 %990 }
 0x37c   : > { %v1218_v40 = vmul.f32 2.0, %v3552_v37  ;;  %v1130_v42 = vpop.f32.mrb[19].mxu1  ;;  %v1250_v44 = vsel %vm739_vm1, %v4189_v34, inf }
 0x37d   : > { %v1217_v46 = vmul.f32 2.0, %v1130_v42  ;;  %1251 = vmin.xlane.f32.xlu1 %v1250_v44  ;;  %v1247_v47 = vsel %vm739_vm1, %v4191_v38, inf }
 0x37e   : > { %1248 = vmin.xlane.f32.xlu0 %v1247_v47  ;;  %v4199_v48 = vsub.f32 %v1202_v39, %v1218_v40  ;;  %v1210_v39 = vadd.f32 %v4185_v24, %v985_v12  ;;  %v988_v40 = vpop.xlane.xlu0 %987 }
 0x37f   : > { %v3555_v50 = vpop.f32.mrb[20].mxu1  ;;  %v4201_v53 = vsub.f32 %v1201_v45, %v1217_v46  ;;  %v1209_v46 = vadd.f32 %v4185_v24, %v982_v15 }
 0x380   : > { %v1220_v56 = vmul.f32 2.0, %v3555_v50  ;;  %v1140_v57 = vpop.f32.mrb[21].mxu1  ;;  %v1256_v58 = vsel %vm739_vm1, %v4199_v48, inf }
 0x381   : > { %v1219_v62 = vmul.f32 2.0, %v1140_v57  ;;  %1257 = vmin.xlane.f32.xlu1 %v1256_v58  ;;  %v1253_v63 = vsel %vm739_vm1, %v4201_v53, inf }
 0x382   : > { %1254 = vmin.xlane.f32.xlu0 %v1253_v63  ;;  %v4209_v0 = vsub.f32 %v1204_v54, %v1220_v56  ;;  %v1212_v56 = vadd.f32 %v4185_v24, %v991_v32  ;;  %v997_v63 = vpop.xlane.xlu1 %996 }
 0x383   : > { %v3558_v1 = vpop.f32.mrb[22].mxu1  ;;  %v4211_v2 = vsub.f32 %v1203_v61, %v1219_v62  ;;  %v1211_v62 = vadd.f32 %v4185_v24, %v988_v40  ;;  %v1214_v12 = vadd.f32 %v4185_v24, %v997_v63 }
 0x384   : > { %v1222_v4 = vmul.f32 2.0, %v3558_v1  ;;  %v1150_v7 = vpop.f32.mrb[23].mxu1  ;;  %v1262_v8 = vsel %vm739_vm1, %v4209_v0, inf }
 0x385   : > { %v1221_v13 = vmul.f32 2.0, %v1150_v7  ;;  %1263 = vmin.xlane.f32.xlu1 %v1262_v8  ;;  %v1259_v14 = vsel %vm739_vm1, %v4211_v2, inf }
 0x386   : > { %1260 = vmin.xlane.f32.xlu0 %v1259_v14  ;;  %v4219_v18 = vsub.f32 %v1206_v3, %v1222_v4  ;;  %v994_v4 = vpop.xlane.xlu0 %993 }
 0x387   : > { %v3561_v20 = vpop.f32.mrb[24].mxu1  ;;  %v4221_v21 = vsub.f32 %v1205_v9, %v1221_v13 }
 0x388   : > { %v1224_v23 = vmul.f32 2.0, %v3561_v20  ;;  %v1160_v25 = vpop.f32.mrb[25].mxu1  ;;  %v1268_v26 = vsel %vm739_vm1, %v4219_v18, inf  ;;  %v1213_v20 = vadd.f32 %v4185_v24, %v994_v4 }
 0x389   : > { %v1223_v16 = vmul.f32 2.0, %v1160_v25  ;;  %1269 = vmin.xlane.f32.xlu1 %v1268_v26  ;;  %v1265_v30 = vsel %vm739_vm1, %v4221_v21, inf }
 0x38a   : > { %1266 = vmin.xlane.f32.xlu0 %v1265_v30  ;;  %v4229_v31 = vsub.f32 %v1208_v22, %v1224_v23  ;;  %v1295_v30 = vlaneseq }
 0x38b   : > { %v3564_v33 = vpop.f32.mrb[26].mxu1  ;;  %v4231_v37 = vsub.f32 %v1207_v29, %v1223_v16 }
 0x38c   : > { %v1226_v42 = vmul.f32 2.0, %v3564_v33  ;;  %v1170_v44 = vpop.f32.mrb[27].mxu1  ;;  %v1274_v45 = vsel %vm739_vm1, %v4229_v31, inf  ;;  %v4267_v24 = vand.u32 127, %v1295_v30 }
 0x38d   : > { %v1225_v47 = vmul.f32 2.0, %v1170_v44  ;;  %1275 = vmin.xlane.f32.xlu1 %v1274_v45  ;;  %v1271_v49 = vsel %vm739_vm1, %v4231_v37, inf }
 0x38e   : > { %1272 = vmin.xlane.f32.xlu0 %v1271_v49  ;;  %v4239_v50 = vsub.f32 %v1210_v39, %v1226_v42 }
 0x38f   : > { %v3567_v54 = vpop.f32.mrb[28].mxu1  ;;  %v4241_v55 = vsub.f32 %v1209_v46, %v1225_v47 }
 0x390   : > { %v1228_v57 = vmul.f32 2.0, %v3567_v54  ;;  %v1180_v58 = vpop.f32.mrb[29].mxu1  ;;  %v1280_v61 = vsel %vm739_vm1, %v4239_v50, inf }
 0x391   : > { %v1227_v1 = vmul.f32 2.0, %v1180_v58  ;;  %1281 = vmin.xlane.f32.xlu1 %v1280_v61  ;;  %v1277_v3 = vsel %vm739_vm1, %v4241_v55, inf }
 0x392   : > { %1278 = vmin.xlane.f32.xlu0 %v1277_v3  ;;  %v4249_v7 = vsub.f32 %v1212_v56, %v1228_v57 }
 0x393   : > { %v3570_v8 = vpop.f32.mrb[30].mxu1  ;;  %v4251_v9 = vsub.f32 %v1211_v62, %v1227_v1 }
 0x394   : > { %v1230_v13 = vmul.f32 2.0, %v3570_v8  ;;  %v1190_v14 = vpop.f32.mrb[31].mxu1  ;;  %v1286_v15 = vsel %vm739_vm1, %v4249_v7, inf }
 0x395   : > { %v1229_v22 = vmul.f32 2.0, %v1190_v14  ;;  %1287 = vmin.xlane.f32.xlu1 %v1286_v15  ;;  %v1283_v23 = vsel %vm739_vm1, %v4251_v9, inf }
 0x396   : > { %1284 = vmin.xlane.f32.xlu0 %v1283_v23  ;;  %v4259_v25 = vsub.f32 %v1214_v12, %v1230_v13 }
 0x397   : > { %v4261_v26 = vsub.f32 %v1213_v20, %v1229_v22 }
 0x398   : > { %v1292_v29 = vsel %vm739_vm1, %v4259_v25, inf }
 0x399   : > { %1293 = vmin.xlane.f32.xlu1 %v1292_v29  ;;  %v1289_v16 = vsel %vm739_vm1, %v4261_v26, inf }
 0x39a   : > { %1290 = vmin.xlane.f32.xlu0 %v1289_v16 }
 0x40a   : > { %v1252_v32 = vpop.xlane.xlu1 %1251 }
 0x40b   : > { %vm1298_vm3 = vcmp.le.f32.partialorder %v4189_v34, %v1252_v32  ;;  %v1249_v33 = vpop.xlane.xlu0 %1248 }
 0x40c   : > { %v1314_v39 = vsel %vm1298_vm3, %v4267_v24, 16  ;;  %vm1297_vm4 = vcmp.le.f32.partialorder %v4191_v38, %v1249_v33 }
 0x40d   : > { %v1313_v40 = vsel %vm1297_vm4, %v4267_v24, 16  ;;  %v4274_v42 = vsel %vm739_vm1, %v1314_v39, 2147483647 }
 0x40e   : > { %v4277_v44 = vsel %vm739_vm1, %v1313_v40, 2147483647  ;;  %v1258_v45 = vpop.xlane.xlu1 %1257  ;;  %v1346_v46 = vshra.s32 %v4274_v42, 16 }
 0x40f   : > { %vm1300_vm5 = vcmp.le.f32.partialorder %v4199_v48, %v1258_v45  ;;  %v1255_v47 = vpop.xlane.xlu0 %1254  ;;  %v1331_v34 = vshra.s32 %v4277_v44, 16 }
 0x410   : > { %v1316_v49 = vsel %vm1300_vm5, %v4267_v24, 16  ;;  %vm1299_vm6 = vcmp.le.f32.partialorder %v4201_v53, %v1255_v47  ;;  %v4284_v38 = vcvt.s32.f32 %v1346_v46 }
 0x411   : > { %v1315_v54 = vsel %vm1299_vm6, %v4267_v24, 16  ;;  %v4287_v56 = vcvt.s32.f32 %v1331_v34  ;;  %v4290_v57 = vsel %vm739_vm1, %v1316_v49, 2147483647 }
 0x412   : > { %v4293_v58 = vsel %vm739_vm1, %v1315_v54, 2147483647  ;;  %1349 = vmin.xlane.f32.xlu1 %v4284_v38  ;;  %v1264_v48 = vpop.xlane.xlu1 %1263  ;;  %v1376_v61 = vshra.s32 %v4290_v57, 16 }
 0x413   : > { %vm1302_vm7 = vcmp.le.f32.partialorder %v4209_v0, %v1264_v48  ;;  %1334 = vmin.xlane.f32.xlu0 %v4287_v56  ;;  %v1261_v53 = vpop.xlane.xlu0 %1260  ;;  %v1361_v62 = vshra.s32 %v4293_v58, 16 }
 0x414   : > { %v1318_v63 = vsel %vm1302_vm7, %v4267_v24, 16  ;;  %vm1301_vm8 = vcmp.le.f32.partialorder %v4211_v2, %v1261_v53  ;;  %v4302_v1 = vcvt.s32.f32 %v1376_v61 }
 0x415   : > { %v1317_v3 = vsel %vm1301_vm8, %v4267_v24, 16  ;;  %v4305_v4 = vcvt.s32.f32 %v1361_v62  ;;  %v4308_v8 = vsel %vm739_vm1, %v1318_v63, 2147483647 }
 0x416   : > { %v4311_v0 = vsel %vm739_vm1, %v1317_v3, 2147483647  ;;  %1379 = vmin.xlane.f32.xlu1 %v4302_v1  ;;  %v1270_v12 = vpop.xlane.xlu1 %1269  ;;  %v1406_v13 = vshra.s32 %v4308_v8, 16 }
 0x417   : > { %vm1304_vm9 = vcmp.le.f32.partialorder %v4219_v18, %v1270_v12  ;;  %1364 = vmin.xlane.f32.xlu0 %v4305_v4  ;;  %v1267_v2 = vpop.xlane.xlu0 %1266  ;;  %v1391_v14 = vshra.s32 %v4311_v0, 16 }
 0x418   : > { %v1320_v15 = vsel %vm1304_vm9, %v4267_v24, 16  ;;  %vm1303_vm10 = vcmp.le.f32.partialorder %v4221_v21, %v1267_v2  ;;  %v4320_v20 = vcvt.s32.f32 %v1406_v13 }
 0x419   : > { %v1319_v22 = vsel %vm1303_vm10, %v4267_v24, 16  ;;  %v4323_v23 = vcvt.s32.f32 %v1391_v14  ;;  %v4326_v29 = vsel %vm739_vm1, %v1320_v15, 2147483647 }
 0x41a   : > { %v4329_v18 = vsel %vm739_vm1, %v1319_v22, 2147483647  ;;  %1409 = vmin.xlane.f32.xlu1 %v4320_v20  ;;  %v1276_v16 = vpop.xlane.xlu1 %1275  ;;  %v1436_v30 = vshra.s32 %v4326_v29, 16 }
 0x41b   : > { %vm1306_vm11 = vcmp.le.f32.partialorder %v4229_v31, %v1276_v16  ;;  %1394 = vmin.xlane.f32.xlu0 %v4323_v23  ;;  %v1273_v21 = vpop.xlane.xlu0 %1272  ;;  %v1421_v32 = vshra.s32 %v4329_v18, 16 }
 0x41c   : > { %v1322_v33 = vsel %vm1306_vm11, %v4267_v24, 16  ;;  %vm1305_vm12 = vcmp.le.f32.partialorder %v4231_v37, %v1273_v21  ;;  %v4338_v39 = vcvt.s32.f32 %v1436_v30 }
 0x41d   : > { %v1321_v40 = vsel %vm1305_vm12, %v4267_v24, 16  ;;  %v4341_v45 = vcvt.s32.f32 %v1421_v32  ;;  %v4344_v46 = vsel %vm739_vm1, %v1322_v33, 2147483647 }
 0x41e   : > { %v4347_v31 = vsel %vm739_vm1, %v1321_v40, 2147483647  ;;  %1439 = vmin.xlane.f32.xlu1 %v4338_v39  ;;  %v1282_v47 = vpop.xlane.xlu1 %1281  ;;  %v1466_v34 = vshra.s32 %v4344_v46, 16 }
 0x41f   : > { %vm1308_vm13 = vcmp.le.f32.partialorder %v4239_v50, %v1282_v47  ;;  %1424 = vmin.xlane.f32.xlu0 %v4341_v45  ;;  %v1279_v37 = vpop.xlane.xlu0 %1278  ;;  %v1451_v49 = vshra.s32 %v4347_v31, 16 }
 0x420   : > { %v1324_v54 = vsel %vm1308_vm13, %v4267_v24, 16  ;;  %vm1307_vm14 = vcmp.le.f32.partialorder %v4241_v55, %v1279_v37  ;;  %v4356_v48 = vcvt.s32.f32 %v1466_v34 }
 0x421   : > { %v1323_v61 = vsel %vm1307_vm14, %v4267_v24, 16  ;;  %v4359_v53 = vcvt.s32.f32 %v1451_v49  ;;  %v4362_v62 = vsel %vm739_vm1, %v1324_v54, 2147483647 }
 0x422   : > { %v4365_v50 = vsel %vm739_vm1, %v1323_v61, 2147483647  ;;  %1469 = vmin.xlane.f32.xlu1 %v4356_v48  ;;  %v1288_v63 = vpop.xlane.xlu1 %1287  ;;  %v1496_v3 = vshra.s32 %v4362_v62, 16  ;;  %v3882_v61 = vmov 32  }
 0x423   : > { %vm1310_vm15 = vcmp.le.f32.partialorder %v4249_v7, %v1288_v63  ;;  %1454 = vmin.xlane.f32.xlu0 %v4359_v53  ;;  %v1285_v55 = vpop.xlane.xlu0 %1284  ;;  %v1481_v12 = vshra.s32 %v4365_v50, 16  ;;  %3825 = vset.pattern.permute.xlu1 %v3882_v61  ;;  %v305_v63 = vld [vmem:[%s5218_s4] sm:$0xff] }
 0x424   : > { %v1326_v13 = vsel %vm1310_vm15, %v4267_v24, 16  ;;  %vm1309_vm3 = vcmp.le.f32.partialorder %v4251_v9, %v1285_v55  ;;  %v4374_v2 = vcvt.s32.f32 %v1496_v3  ;;  %3824 = vset.pattern.permute.xlu0 %v3882_v61  ;;  %v306_v3 = vld [vmem:[%s5218_s4 + $0x8] sm:$0xff] }
 0x425   : > { %v1325_v14 = vsel %vm1309_vm3, %v4267_v24, 16  ;;  %v4377_v15 = vcvt.s32.f32 %v1481_v12  ;;  %v4380_v22 = vsel %vm739_vm1, %v1326_v13, 2147483647  ;;  %v3740_v55 = vpack.c.bf16 %v306_v3, %v305_v63 }
 0x426   : > { %v4383_v7 = vsel %vm739_vm1, %v1325_v14, 2147483647  ;;  %1499 = vmin.xlane.f32.xlu1 %v4374_v2  ;;  %v1294_v16 = vpop.xlane.xlu1 %1293  ;;  %v1526_v30 = vshra.s32 %v4380_v22, 16  ;;  %v1345_v12 = vand.u32 65535, %v4274_v42  ;;  %v1330_v13 = vand.u32 65535, %v4277_v44 }
 0x427   : > { %vm1312_vm4 = vcmp.le.f32.partialorder %v4259_v25, %v1294_v16  ;;  %1484 = vmin.xlane.f32.xlu0 %v4377_v15  ;;  %v1291_v9 = vpop.xlane.xlu0 %1290  ;;  %v1511_v21 = vshra.s32 %v4383_v7, 16  ;;  %3741 = vmatprep.subr.bf16.mxu0 %v3740_v55 }
 0x428   : > { %v1328_v32 = vsel %vm1312_vm4, %v4267_v24, 16  ;;  %vm1311_vm5 = vcmp.le.f32.partialorder %v4261_v26, %v1291_v9  ;;  %v4392_v33 = vcvt.s32.f32 %v1526_v30  ;;  %3743 = vmatpush3.bf16.msra.mxu0 %v3740_v55  ;;  %v1347_v16 = vcvt.s32.f32 %v1345_v12 }
 0x429   : > { %v1327_v40 = vsel %vm1311_vm5, %v4267_v24, 16  ;;  %v4395_v47 = vcvt.s32.f32 %v1511_v21  ;;  %v4398_v34 = vsel %vm739_vm1, %v1328_v32, 2147483647  ;;  %v1375_v30 = vand.u32 65535, %v4290_v57 }
 0x42a   : > { %v4401_v25 = vsel %vm739_vm1, %v1327_v40, 2147483647  ;;  %1529 = vmin.xlane.f32.xlu1 %v4392_v33  ;;  %v1556_v37 = vshra.s32 %v4398_v34, 16  ;;  %v1332_v21 = vcvt.s32.f32 %v1330_v13  ;;  %v1360_v32 = vand.u32 65535, %v4293_v58 }
 0x42b   : > { %1514 = vmin.xlane.f32.xlu0 %v4395_v47  ;;  %v1541_v26 = vshra.s32 %v4401_v25, 16  ;;  %v1405_v57 = vand.u32 65535, %v4308_v8  ;;  %v1390_v58 = vand.u32 65535, %v4311_v0  ;;  %v1435_v8 = vand.u32 65535, %v4326_v29 }
 0x42c   : > { %v4407_v49 = vcvt.s32.f32 %v1556_v37  ;;  %v1377_v37 = vcvt.s32.f32 %v1375_v30  ;;  %v1420_v0 = vand.u32 65535, %v4329_v18  ;;  %v1465_v29 = vand.u32 65535, %v4344_v46 }
 0x42d   : > { %v4409_v54 = vcvt.s32.f32 %v1541_v26  ;;  %v1407_v3 = vcvt.s32.f32 %v1405_v57  ;;  %v1450_v18 = vand.u32 65535, %v4347_v31  ;;  %v1495_v46 = vand.u32 65535, %v4362_v62 }
 0x42e   : > { %1559 = vmin.xlane.f32.xlu1 %v4407_v49  ;;  %v1480_v31 = vand.u32 65535, %v4365_v50  ;;  %v1525_v62 = vand.u32 65535, %v4380_v22  ;;  %v1510_v50 = vand.u32 65535, %v4383_v7  ;;  %v1555_v22 = vand.u32 65535, %v4398_v34 }
 0x42f   : > { %1544 = vmin.xlane.f32.xlu0 %v4409_v54  ;;  %v1540_v7 = vand.u32 65535, %v4401_v25 }
 0x430   : > { %v1557_v34 = vcvt.s32.f32 %v1555_v22 }
 0x49f   : > { %v4421_v14 = vpop.xlane.xlu1 %1349 }
 0x4a0   : > { %v4424_v9 = vpop.xlane.xlu0 %1334  ;;  %vm1351_vm6 = vcmp.eq.f32.partialorder %v4284_v38, %v4421_v14  ;;  %v1362_v38 = vcvt.s32.f32 %v1360_v32 }
 0x4a1   : > { %v1352_v40 = vsel %vm1351_vm6, %v1347_v16, inf  ;;  %vm1336_vm7 = vcmp.eq.f32.partialorder %v4287_v56, %v4424_v9  ;;  %v1437_v16 = vcvt.s32.f32 %v1435_v8 }
 0x4a2   : > { %1353 = vmin.xlane.f32.xlu1 %v1352_v40  ;;  %v1337_v42 = vsel %vm1336_vm7, %v1332_v21, inf  ;;  %v1467_v40 = vcvt.s32.f32 %v1465_v29 }
 0x4a3   : > { %v4431_v44 = vpop.xlane.xlu1 %1379  ;;  %1338 = vmin.xlane.f32.xlu0 %v1337_v42 }
 0x4a4   : > { %v4434_v26 = vpop.xlane.xlu0 %1364  ;;  %vm1381_vm8 = vcmp.eq.f32.partialorder %v4302_v1, %v4431_v44  ;;  %v1392_v1 = vcvt.s32.f32 %v1390_v58 }
 0x4a5   : > { %v1382_v61 = vsel %vm1381_vm8, %v1377_v37, inf  ;;  %vm1366_vm9 = vcmp.eq.f32.partialorder %v4305_v4, %v4434_v26 }
 0x4a6   : > { %1383 = vmin.xlane.f32.xlu1 %v1382_v61  ;;  %v1367_v56 = vsel %vm1366_vm9, %v1362_v38, inf  ;;  %v1497_v38 = vcvt.s32.f32 %v1495_v46 }
 0x4a7   : > { %v4441_v63 = vpop.xlane.xlu1 %1409  ;;  %1368 = vmin.xlane.f32.xlu0 %v1367_v56 }
 0x4a8   : > { %v4444_v55 = vpop.xlane.xlu0 %1394  ;;  %vm1411_vm10 = vcmp.eq.f32.partialorder %v4320_v20, %v4441_v63  ;;  %v1422_v20 = vcvt.s32.f32 %v1420_v0 }
 0x4a9   : > { %v1412_v12 = vsel %vm1411_vm10, %v1407_v3, inf  ;;  %vm1396_vm11 = vcmp.eq.f32.partialorder %v4323_v23, %v4444_v55  ;;  %v1527_v3 = vcvt.s32.f32 %v1525_v62 }
 0x4aa   : > { %1413 = vmin.xlane.f32.xlu1 %v1412_v12  ;;  %v1397_v4 = vsel %vm1396_vm11, %v1392_v1, inf }
 0x4ab   : > { %v4451_v13 = vpop.xlane.xlu1 %1439  ;;  %1398 = vmin.xlane.f32.xlu0 %v1397_v4  ;;  %v3858_v4 = vld [vmem:[%s3958_s15 + $0x8] sm:$0xff] }
 0x4ac   : > { %v4454_v30 = vpop.xlane.xlu0 %1424  ;;  %vm1441_vm12 = vcmp.eq.f32.partialorder %v4338_v39, %v4451_v13  ;;  %v1452_v39 = vcvt.s32.f32 %v1450_v18 }
 0x4ad   : > { %v1442_v21 = vsel %vm1441_vm12, %v1437_v16, inf  ;;  %vm1426_vm13 = vcmp.eq.f32.partialorder %v4341_v45, %v4454_v30  ;;  %v3782_v16 = vtrunc.f32 %v3858_v4 }
 0x4ae   : > { %1443 = vmin.xlane.f32.xlu1 %v1442_v21  ;;  %v1427_v23 = vsel %vm1426_vm13, %v1422_v20, inf  ;;  %v3859_v20 = vld [vmem:[%s3958_s15 + $0x10] sm:$0xff]  ;;  %v3860_v21 = vld [vmem:[%s3958_s15] sm:$0xff] }
 0x4af   : > { %v4461_v32 = vpop.xlane.xlu1 %1469  ;;  %1428 = vmin.xlane.f32.xlu0 %v1427_v23  ;;  %v3783_v29 = vcvt.f32.s32 %v3782_v16  ;;  %v3784_v18 = vtrunc.f32 %v3859_v20  ;;  %v3780_v23 = vtrunc.f32 %v3860_v21  ;;  %v3869_v16 = vld [vmem:[%s3958_s15 + $0x40] sm:$0xff] }
 0x4b0   : > { %v4464_v42 = vpop.xlane.xlu0 %1454  ;;  %vm1471_vm14 = vcmp.eq.f32.partialorder %v4356_v48, %v4461_v32  ;;  %v1482_v48 = vcvt.s32.f32 %v1480_v31 }
 0x4b1   : > { %v1472_v37 = vsel %vm1471_vm14, %v1467_v40, inf  ;;  %vm1456_vm15 = vcmp.eq.f32.partialorder %v4359_v53, %v4464_v42  ;;  %v3861_v40 = vld [vmem:[%s3958_s15 + $0x18] sm:$0xff] }
 0x4b2   : > { %1473 = vmin.xlane.f32.xlu1 %v1472_v37  ;;  %v1457_v45 = vsel %vm1456_vm15, %v1452_v39, inf  ;;  %v3786_v46 = vtrunc.f32 %v3861_v40  ;;  %v3781_v39 = vcvt.f32.s32 %v3780_v23 }
 0x4b3   : > { %v4471_v57 = vpop.xlane.xlu1 %1499  ;;  %1458 = vmin.xlane.f32.xlu0 %v1457_v45  ;;  %v3863_v45 = vld [vmem:[%s3958_s15 + $0x20] sm:$0xff] }
 0x4b4   : > { %v4474_v58 = vpop.xlane.xlu0 %1484  ;;  %vm1501_vm3 = vcmp.eq.f32.partialorder %v4374_v2, %v4471_v57  ;;  %v1512_v2 = vcvt.s32.f32 %v1510_v50  ;;  %v3787_v37 = vcvt.f32.s32 %v3786_v46 }
 0x4b5   : > { %v1502_v61 = vsel %vm1501_vm3, %v1497_v38, inf  ;;  %vm1486_vm4 = vcmp.eq.f32.partialorder %v4377_v15, %v4474_v58  ;;  %v3788_v38 = vtrunc.f32 %v3863_v45  ;;  %v3873_v45 = vld [vmem:[%s3958_s15 + $0x70] sm:$0xff] }
 0x4b6   : > { %1503 = vmin.xlane.f32.xlu1 %v1502_v61  ;;  %v1487_v53 = vsel %vm1486_vm4, %v1482_v48, inf  ;;  %v3864_v48 = vld [vmem:[%s3958_s15 + $0x48] sm:$0xff] }
 0x4b7   : > { %v4481_v56 = vpop.xlane.xlu1 %1529  ;;  %1488 = vmin.xlane.f32.xlu0 %v1487_v53  ;;  %v3798_v50 = vtrunc.f32 %v3864_v48  ;;  %v3789_v61 = vcvt.f32.s32 %v3788_v38  ;;  %v3865_v53 = vld [vmem:[%s3958_s15 + $0x28] sm:$0xff]  ;;  %v3808_v38 = vtrunc.f32 %v3873_v45  ;;  %v292_v48 = vld [vmem:[%s5216_s2] sm:$0xff] }
 0x4b8   : > { %v4484_v8 = vpop.xlane.xlu0 %1514  ;;  %vm1531_vm5 = vcmp.eq.f32.partialorder %v4392_v33, %v4481_v56  ;;  %v1542_v33 = vcvt.s32.f32 %v1540_v7  ;;  %3599 = vmatprep.subr.mxu1 %v292_v48 }
 0x4b9   : > { %v1532_v1 = vsel %vm1531_vm5, %v1527_v3, inf  ;;  %vm1516_vm6 = vcmp.eq.f32.partialorder %v4395_v47, %v4484_v8  ;;  %v3790_v3 = vtrunc.f32 %v3865_v53  ;;  %v3799_v22 = vcvt.f32.s32 %v3798_v50  ;;  %3600 = vmatpush3.msra.mxu1 %v292_v48 }
 0x4ba   : > { %1533 = vmin.xlane.f32.xlu1 %v1532_v1  ;;  %v1517_v15 = vsel %vm1516_vm6, %v1512_v2, inf  ;;  %v3866_v2 = vld [vmem:[%s3958_s15 + $0x58] sm:$0xff]  ;;  %v1356_v50 = vcvt.f32.s32 %v4421_v14 }
 0x4bb   : > { %v4491_v0 = vpop.xlane.xlu1 %1559  ;;  %1518 = vmin.xlane.f32.xlu0 %v1517_v15  ;;  %v3802_v7 = vtrunc.f32 %v3866_v2  ;;  %v3791_v1 = vcvt.f32.s32 %v3790_v3  ;;  %v3867_v15 = vld [vmem:[%s3958_s15 + $0x30] sm:$0xff]  ;;  %v1371_v2 = vcvt.f32.s32 %v4434_v26  ;;  %v1401_v26 = vcvt.f32.s32 %v4444_v55 }
 0x4bc   : > { %v4493_v12 = vpop.xlane.xlu0 %1544  ;;  %vm1561_vm7 = vcmp.eq.f32.partialorder %v4407_v49, %v4491_v0  ;;  %v3785_v49 = vcvt.f32.s32 %v3784_v18  ;;  %v3870_v18 = vld [vmem:[%s3958_s15 + $0x78] sm:$0xff]  ;;  %v1357_v3 = vshll.u32 %v1356_v50, 16 }
 0x4bd   : > { %v1562_v25 = vsel %vm1561_vm7, %v1557_v34, inf  ;;  %vm1546_vm8 = vcmp.eq.f32.partialorder %v4409_v54, %v4493_v12  ;;  %v3862_v54 = vld [vmem:[%s3958_s15 + $0x38] sm:$0xff]  ;;  %v3792_v34 = vtrunc.f32 %v3867_v15  ;;  %v3810_v21 = vtrunc.f32 %v3870_v18 }
 0x4be   : > { %1563 = vmin.xlane.f32.xlu1 %v1562_v25  ;;  %v1547_v47 = vsel %vm1546_vm8, %v1542_v33, inf  ;;  %v3794_v31 = vtrunc.f32 %v3862_v54  ;;  %v3803_v33 = vcvt.f32.s32 %v3802_v7  ;;  %v3868_v25 = vld [vmem:[%s3958_s15 + $0x68] sm:$0xff]  ;;  %v3872_v54 = vld [vmem:[%s3958_s15 + $0x60] sm:$0xff]  ;;  %v1402_v45 = vshll.u32 %v1401_v26, 16 }
 0x4bf   : > { %1548 = vmin.xlane.f32.xlu0 %v1547_v47  ;;  %v3806_v47 = vtrunc.f32 %v3868_v25  ;;  %v3793_v4 = vcvt.f32.s32 %v3792_v34  ;;  %v3811_v46 = vcvt.f32.s32 %v3810_v21  ;;  %v1416_v25 = vcvt.f32.s32 %v4441_v63 }
 0x4c0   : > { %v3795_v62 = vcvt.f32.s32 %v3794_v31  ;;  %v3804_v31 = vtrunc.f32 %v3872_v54 }
 0x4c1   : > { %v3807_v20 = vcvt.f32.s32 %v3806_v47 }
 0x4cf   : > { %2768 = vperm.xlu1 %3825, %v3783_v29   ;;  %v3796_v29 = vtrunc.f32 %v3869_v16  ;;  %v1372_v16 = vshll.u32 %v1371_v2, 16 }
 0x4d1   : > { %v3797_v23 = vcvt.f32.s32 %v3796_v29  ;;  %v5221_v29 = vmov 0.0  }
 0x4d3   : > { %2771 = vperm.xlu1 %3825, %v3785_v49   ;;  %v3871_v49 = vld [vmem:[%s3958_s15 + $0x50] sm:$0xff] }
 0x4d4   : > { %v3800_v40 = vtrunc.f32 %v3871_v49  ;;  %v1417_v49 = vshll.u32 %v1416_v25, 16 }
 0x4d5   : > { %2765 = vperm.xlu0 %3824, %v3781_v39  }
 0x4d6   : > { %v3801_v39 = vcvt.f32.s32 %v3800_v40 }
 0x4d7   : > { %2774 = vperm.xlu1 %3825, %v3787_v37   ;;  %v3805_v37 = vcvt.f32.s32 %v3804_v31 }
 0x4d9   : > { %2786 = vperm.xlu0 %3824, %v3795_v62   ;;  %v3809_v62 = vcvt.f32.s32 %v3808_v38  ;;  %v1431_v38 = vcvt.f32.s32 %v4454_v30 }
 0x4db   : > { %2777 = vperm.xlu1 %3825, %v3789_v61   ;;  %v1341_v61 = vcvt.f32.s32 %v4424_v9 }
 0x4dd   : > { %2792 = vperm.xlu0 %3824, %v3799_v22   ;;  %v1386_v22 = vcvt.f32.s32 %v4431_v44  ;;  %v1342_v15 = vshll.u32 %v1341_v61, 16  ;;  %v1476_v61 = vcvt.f32.s32 %v4461_v32 }
 0x4df   : > { %2780 = vperm.xlu1 %3825, %v3791_v1   ;;  %v1387_v14 = vshll.u32 %v1386_v22, 16 }
 0x4e1   : > { %2798 = vperm.xlu0 %3824, %v3803_v33  }
 0x4e3   : > { %2783 = vperm.xlu1 %3825, %v3793_v4  }
 0x4e5   : > { %2804 = vperm.xlu0 %3824, %v3807_v20  }
 0x4e7   : > { %2789 = vperm.xlu1 %3825, %v3797_v23  }
 0x4e9   : > { %2810 = vperm.xlu0 %3824, %v3811_v46  }
 0x4eb   : > { %2795 = vperm.xlu1 %3825, %v3801_v39   ;;  %v1446_v39 = vcvt.f32.s32 %v4451_v13 }
 0x4ed   : > { %v1447_v2 = vshll.u32 %v1446_v39, 16 }
 0x4ef   : > { %2801 = vperm.xlu1 %3825, %v3805_v37  }
 0x4f3   : > { %2807 = vperm.xlu1 %3825, %v3809_v62  }
 0x52f   : > { %v1354_v53 = vpop.xlane.xlu1 %1353 }
 0x530   : > { %v1355_v7 = vcvt.f32.s32 %v1354_v53  ;;  %v1339_v1 = vpop.xlane.xlu0 %1338  ;;  %v1461_v53 = vcvt.f32.s32 %v4464_v42 }
 0x531   : > { %v1340_v34 = vcvt.f32.s32 %v1339_v1 }
 0x532   : > { %v4522_v33 = vadd.s32 %v1357_v3, %v1355_v7 }
 0x533   : > { %v4525_v47 = vadd.s32 %v1342_v15, %v1340_v34  ;;  %v1384_v4 = vpop.xlane.xlu1 %1383  ;;  %v1432_v34 = vshll.u32 %v1431_v38, 16  ;;  %v1536_v38 = vcvt.f32.s32 %v4481_v56 }
 0x534   : > { %vm1570_vm9 = vcmp.eq.s32.totalorder %v4267_v24, %v4522_v33  ;;  %v1385_v9 = vcvt.f32.s32 %v1384_v4  ;;  %v1369_v44 = vpop.xlane.xlu0 %1368 }
 0x535   : > { %v3188_v20 = vsel %vm1570_vm9, 1.0, %v5221_v29  ;;  %v1370_v18 = vcvt.f32.s32 %v1369_v44  ;;  %vm1569_vm10 = vcmp.eq.s32.totalorder %v4267_v24, %v4525_v47  ;;  %v1462_v44 = vshll.u32 %v1461_v53, 16 }
 0x536   : > { %v4533_v63 = vadd.s32 %v1387_v14, %v1385_v9  ;;  %v3187_v21 = vsel %vm1569_vm10, 1.0, %v5221_v29  ;;  %v2712_v23 = vsel %vm739_vm1, %v3188_v20, 0.0  ;;  %v1477_v9 = vshll.u32 %v1476_v61, 16 }
 0x537   : > { %v4537_v40 = vadd.s32 %v1372_v16, %v1370_v18  ;;  %v1414_v46 = vpop.xlane.xlu1 %1413  ;;  %3575 = vmatprep.mubr.msk.f32.mxu0 %vm739_vm1, %v3187_v21  ;;  %v2711_v55 = vsel %vm739_vm1, %v3187_v21, 0.0  ;;  %v1506_v21 = vcvt.f32.s32 %v4471_v57 }
 0x538   : > { %v1415_v54 = vcvt.f32.s32 %v1414_v46  ;;  %v2713_v31 = vadd.f32 %v2712_v23, %v2711_v55  ;;  %3576 = vmatmul.mubr.msk.f32.vlgmr.msra.gmra.mrb[32].mxu0 %vm739_vm1, %v3188_v20  ;;  %v1399_v37 = vpop.xlane.xlu0 %1398  ;;  %vm1572_vm11 = vcmp.eq.s32.totalorder %v4267_v24, %v4533_v63  ;;  %v1491_v55 = vcvt.f32.s32 %v4474_v58 }
 0x539   : > { %v1400_v62 = vcvt.f32.s32 %v1399_v37  ;;  %vm1571_vm12 = vcmp.eq.s32.totalorder %v4267_v24, %v4537_v40  ;;  %v3190_v13 = vsel %vm1572_vm11, 1.0, %v5221_v29  ;;  %v1507_v61 = vshll.u32 %v1506_v21, 16 }
 0x53a   : > { %v4548_v48 = vadd.s32 %v1417_v49, %v1415_v54  ;;  %v3189_v50 = vsel %vm1571_vm12, 1.0, %v5221_v29  ;;  %v2716_v32 = vsel %vm739_vm1, %v3190_v13, 0.0  ;;  %v1551_v21 = vcvt.f32.s32 %v4493_v12 }
 0x53b   : > { %v4554_v3 = vadd.s32 %v1402_v45, %v1400_v62  ;;  %v1444_v22 = vpop.xlane.xlu1 %1443  ;;  %3578 = vmatprep.mubr.msk.f32.mxu0 %vm739_vm1, %v3189_v50  ;;  %v2714_v30 = vsel %vm739_vm1, %v3189_v50, 0.0  ;;  %v1521_v62 = vcvt.f32.s32 %v4484_v8 }
 0x53c   : > { %v1445_v7 = vcvt.f32.s32 %v1444_v22  ;;  %v2715_v1 = vadd.f32 %v2714_v30, %v2713_v31  ;;  %3579 = vmatmul.mubr.msk.f32.gmra.mrb[34].mxu0 %vm739_vm1, %v3190_v13  ;;  %v1429_v15 = vpop.xlane.xlu0 %1428  ;;  %vm1574_vm13 = vcmp.eq.s32.totalorder %v4267_v24, %v4548_v48 }
 0x53d   : > { %v1430_v42 = vcvt.f32.s32 %v1429_v15  ;;  %vm1573_vm14 = vcmp.eq.s32.totalorder %v4267_v24, %v4554_v3  ;;  %v3192_v16 = vsel %vm1574_vm13, 1.0, %v5221_v29 }
 0x53e   : > { %v4564_v25 = vadd.s32 %v1447_v2, %v1445_v7  ;;  %v2717_v4 = vadd.f32 %v2716_v32, %v2715_v1  ;;  %v3191_v14 = vsel %vm1573_vm14, 1.0, %v5221_v29  ;;  %v2720_v39 = vsel %vm739_vm1, %v3192_v16, 0.0 }
 0x53f   : > { %v4568_v26 = vadd.s32 %v1432_v34, %v1430_v42  ;;  %v1474_v20 = vpop.xlane.xlu1 %1473  ;;  %3581 = vmatprep.mubr.msk.f32.mxu0 %vm739_vm1, %v3191_v14  ;;  %v2718_v18 = vsel %vm739_vm1, %v3191_v14, 0.0  ;;  %v1492_v2 = vshll.u32 %v1491_v55, 16  ;;  %v1537_v32 = vshll.u32 %v1536_v38, 16 }
 0x540   : > { %v1475_v23 = vcvt.f32.s32 %v1474_v20  ;;  %v2719_v49 = vadd.f32 %v2718_v18, %v2717_v4  ;;  %3582 = vmatmul.mubr.msk.f32.gmra.mrb[36].mxu0 %vm739_vm1, %v3192_v16  ;;  %v1459_v46 = vpop.xlane.xlu0 %1458  ;;  %vm1576_vm15 = vcmp.eq.s32.totalorder %v4267_v24, %v4564_v25  ;;  %v1522_v42 = vshll.u32 %v1521_v62, 16 }
 0x541   : > { %v1460_v54 = vcvt.f32.s32 %v1459_v46  ;;  %vm1575_vm3 = vcmp.eq.s32.totalorder %v4267_v24, %v4568_v26  ;;  %v3194_v45 = vsel %vm1576_vm15, 1.0, %v5221_v29 }
 0x542   : > { %v4580_v31 = vadd.s32 %v1477_v9, %v1475_v23  ;;  %v2721_v37 = vadd.f32 %v2720_v39, %v2719_v49  ;;  %v3193_v57 = vsel %vm1575_vm3, 1.0, %v5221_v29  ;;  %v2724_v56 = vsel %vm739_vm1, %v3194_v45, 0.0 }
 0x543   : > { %v4586_v50 = vadd.s32 %v1462_v44, %v1460_v54  ;;  %v1504_v58 = vpop.xlane.xlu1 %1503  ;;  %3584 = vmatprep.mubr.msk.f32.mxu0 %vm739_vm1, %v3193_v57  ;;  %v2722_v13 = vsel %vm739_vm1, %v3193_v57, 0.0  ;;  %v1566_v9 = vcvt.f32.s32 %v4491_v0 }
 0x544   : > { %v1505_v53 = vcvt.f32.s32 %v1504_v58  ;;  %v2723_v22 = vadd.f32 %v2722_v13, %v2721_v37  ;;  %3585 = vmatmul.mubr.msk.f32.gmra.mrb[38].mxu0 %vm739_vm1, %v3194_v45  ;;  %v1489_v30 = vpop.xlane.xlu0 %1488  ;;  %vm1578_vm4 = vcmp.eq.s32.totalorder %v4267_v24, %v4580_v31  ;;  %v1552_v58 = vshll.u32 %v1551_v21, 16 }
 0x545   : > { %v1490_v8 = vcvt.f32.s32 %v1489_v30  ;;  %vm1577_vm5 = vcmp.eq.s32.totalorder %v4267_v24, %v4586_v50  ;;  %v3196_v34 = vsel %vm1578_vm4, 1.0, %v5221_v29  ;;  %v1567_v57 = vshll.u32 %v1566_v9, 16 }
 0x546   : > { %v4596_v7 = vadd.s32 %v1507_v61, %v1505_v53  ;;  %v2725_v1 = vadd.f32 %v2724_v56, %v2723_v22  ;;  %v3195_v15 = vsel %vm1577_vm5, 1.0, %v5221_v29  ;;  %v2728_v23 = vsel %vm739_vm1, %v3196_v34, 0.0 }
 0x547   : > { %v4600_v4 = vadd.s32 %v1492_v2, %v1490_v8  ;;  %v1534_v14 = vpop.xlane.xlu1 %1533  ;;  %3587 = vmatprep.mubr.msk.f32.mxu0 %vm739_vm1, %v3195_v15  ;;  %v2726_v16 = vsel %vm739_vm1, %v3195_v15, 0.0 }
 0x548   : > { %v1535_v44 = vcvt.f32.s32 %v1534_v14  ;;  %v2727_v20 = vadd.f32 %v2726_v16, %v2725_v1  ;;  %3588 = vmatmul.mubr.msk.f32.gmra.mrb[40].mxu0 %vm739_vm1, %v3196_v34  ;;  %v1519_v18 = vpop.xlane.xlu0 %1518  ;;  %vm1580_vm6 = vcmp.eq.s32.totalorder %v4267_v24, %v4596_v7 }
 0x549   : > { %v1520_v49 = vcvt.f32.s32 %v1519_v18  ;;  %vm1579_vm7 = vcmp.eq.s32.totalorder %v4267_v24, %v4600_v4  ;;  %v3198_v39 = vsel %vm1580_vm6, 1.0, %v5221_v29 }
 0x54a   : > { %v4612_v46 = vadd.s32 %v1537_v32, %v1535_v44  ;;  %v2729_v55 = vadd.f32 %v2728_v23, %v2727_v20  ;;  %v3197_v0 = vsel %vm1579_vm7, 1.0, %v5221_v29  ;;  %v2732_v13 = vsel %vm739_vm1, %v3198_v39, 0.0 }
 0x54b   : > { %v4616_v54 = vadd.s32 %v1522_v42, %v1520_v49  ;;  %v1564_v37 = vpop.xlane.xlu1 %1563  ;;  %3590 = vmatprep.mubr.msk.f32.mxu0 %vm739_vm1, %v3197_v0  ;;  %v2730_v12 = vsel %vm739_vm1, %v3197_v0, 0.0 }
 0x54c   : > { %v1565_v45 = vcvt.f32.s32 %v1564_v37  ;;  %v2731_v38 = vadd.f32 %v2730_v12, %v2729_v55  ;;  %3591 = vmatmul.mubr.msk.f32.gmra.mrb[42].mxu0 %vm739_vm1, %v3198_v39  ;;  %v1549_v62 = vpop.xlane.xlu0 %1548  ;;  %vm1582_vm8 = vcmp.eq.s32.totalorder %v4267_v24, %v4612_v46 }
 0x54d   : > { %v1550_v61 = vcvt.f32.s32 %v1549_v62  ;;  %vm1581_vm9 = vcmp.eq.s32.totalorder %v4267_v24, %v4616_v54  ;;  %v3200_v2 = vsel %vm1582_vm8, 1.0, %v5221_v29 }
 0x54e   : > { %v4626_v53 = vadd.s32 %v1567_v57, %v1565_v45  ;;  %v2733_v22 = vadd.f32 %v2732_v13, %v2731_v38  ;;  %v3199_v30 = vsel %vm1581_vm9, 1.0, %v5221_v29  ;;  %v2736_v15 = vsel %vm739_vm1, %v3200_v2, 0.0 }
 0x54f   : > { %v4630_v56 = vadd.s32 %v1552_v58, %v1550_v61  ;;  %3593 = vmatprep.mubr.msk.f32.mxu0 %vm739_vm1, %v3199_v30  ;;  %v2734_v8 = vsel %vm739_vm1, %v3199_v30, 0.0 }
 0x550   : > { %v2735_v1 = vadd.f32 %v2734_v8, %v2733_v22  ;;  %3594 = vmatmul.mubr.msk.f32.gmra.mrb[44].mxu0 %vm739_vm1, %v3200_v2  ;;  %vm1584_vm10 = vcmp.eq.s32.totalorder %v4267_v24, %v4626_v53 }
 0x551   : > { %5225 = vst [vmem:[#allocation2_spill] sm:$0xff] %v4630_v56  ;;  %vm1583_vm11 = vcmp.eq.s32.totalorder %v4267_v24, %v4630_v56  ;;  %v3202_v42 = vsel %vm1584_vm10, 1.0, %v5221_v29 }
 0x552   : > { %v2737_v34 = vadd.f32 %v2736_v15, %v2735_v1  ;;  %v3201_v32 = vsel %vm1583_vm11, 1.0, %v5221_v29  ;;  %v2740_v9 = vsel %vm739_vm1, %v3202_v42, 0.0 }
 0x553   : > { %3596 = vmatprep.mubr.msk.f32.mxu0 %vm739_vm1, %v3201_v32  ;;  %v2738_v14 = vsel %vm739_vm1, %v3201_v32, 0.0 }
 0x554   : > { %v2739_v16 = vadd.f32 %v2738_v14, %v2737_v34  ;;  %3597 = vmatmul.mubr.msk.f32.gmra.mrb[46].mxu0 %vm739_vm1, %v3202_v42 }
 0x556   : > { %v4646_v44 = vadd.f32 %v2740_v9, %v2739_v16 }
 0x60b   : > { %v4648_v20 = vpop.f32.mrb[32].mxu0 }
 0x60c   : > { %v4650_v18 = vpop.f32.mrb[33].mxu0  ;;  %v2600_v21 = vmul.f32 %v4648_v20, %v4648_v20 }
 0x60d   : > { %3601 = vmatprep.mubr.msk.f32.mxu1 %vm949_vm2, %v4650_v18  ;;  %v2599_v23 = vmul.f32 %v4650_v18, %v4650_v18 }
 0x60e   : > { %3602 = vmatmul.mubr.msk.f32.vlgmr.msra.gmra.mrb[32].mxu1 %vm949_vm2, %v4648_v20  ;;  %v2618_v49 = vsel %vm949_vm2, %v2600_v21, 0.0 }
 0x60f   : > { %2619 = vadd.xlane.f32.xlu0 %v2618_v49  ;;  %v4661_v55 = vpop.f32.mrb[34].mxu0  ;;  %v2615_v0 = vsel %vm949_vm2, %v2599_v23, 0.0 }
 0x610   : > { %2616 = vadd.xlane.f32.xlu1 %v2615_v0  ;;  %v4664_v39 = vpop.f32.mrb[35].mxu0  ;;  %v2602_v37 = vmul.f32 %v4661_v55, %v4661_v55 }
 0x611   : > { %3604 = vmatprep.mubr.msk.f32.mxu1 %vm949_vm2, %v4664_v39  ;;  %v2601_v12 = vmul.f32 %v4664_v39, %v4664_v39 }
 0x612   : > { %3605 = vmatmul.mubr.msk.f32.gmra.mrb[34].mxu1 %vm949_vm2, %v4661_v55  ;;  %v2624_v57 = vsel %vm949_vm2, %v2602_v37, 0.0 }
 0x613   : > { %2625 = vadd.xlane.f32.xlu0 %v2624_v57  ;;  %v4675_v45 = vpop.f32.mrb[36].mxu0  ;;  %v2621_v38 = vsel %vm949_vm2, %v2601_v12, 0.0 }
 0x614   : > { %2622 = vadd.xlane.f32.xlu1 %v2621_v38  ;;  %v4678_v62 = vpop.f32.mrb[37].mxu0  ;;  %v2604_v58 = vmul.f32 %v4675_v45, %v4675_v45 }
 0x615   : > { %3607 = vmatprep.mubr.msk.f32.mxu1 %vm949_vm2, %v4678_v62  ;;  %v2603_v13 = vmul.f32 %v4678_v62, %v4678_v62 }
 0x616   : > { %3608 = vmatmul.mubr.msk.f32.gmra.mrb[36].mxu1 %vm949_vm2, %v4675_v45  ;;  %v2630_v61 = vsel %vm949_vm2, %v2604_v58, 0.0 }
 0x617   : > { %2631 = vadd.xlane.f32.xlu0 %v2630_v61  ;;  %v4689_v22 = vpop.f32.mrb[38].mxu0  ;;  %v2627_v30 = vsel %vm949_vm2, %v2603_v13, 0.0 }
 0x618   : > { %2628 = vadd.xlane.f32.xlu1 %v2627_v30  ;;  %v4692_v2 = vpop.f32.mrb[39].mxu0  ;;  %v2606_v8 = vmul.f32 %v4689_v22, %v4689_v22 }
 0x619   : > { %3610 = vmatprep.mubr.msk.f32.mxu1 %vm949_vm2, %v4692_v2  ;;  %v2605_v1 = vmul.f32 %v4692_v2, %v4692_v2 }
 0x61a   : > { %3611 = vmatmul.mubr.msk.f32.gmra.mrb[38].mxu1 %vm949_vm2, %v4689_v22  ;;  %v2636_v15 = vsel %vm949_vm2, %v2606_v8, 0.0 }
 0x61b   : > { %2637 = vadd.xlane.f32.xlu0 %v2636_v15  ;;  %v4703_v34 = vpop.f32.mrb[40].mxu0  ;;  %v2633_v32 = vsel %vm949_vm2, %v2605_v1, 0.0 }
 0x61c   : > { %2634 = vadd.xlane.f32.xlu1 %v2633_v32  ;;  %v4706_v42 = vpop.f32.mrb[41].mxu0  ;;  %v2608_v14 = vmul.f32 %v4703_v34, %v4703_v34 }
 0x61d   : > { %3613 = vmatprep.mubr.msk.f32.mxu1 %vm949_vm2, %v4706_v42  ;;  %v2607_v16 = vmul.f32 %v4706_v42, %v4706_v42 }
 0x61e   : > { %3614 = vmatmul.mubr.msk.f32.gmra.mrb[40].mxu1 %vm949_vm2, %v4703_v34  ;;  %v2642_v9 = vsel %vm949_vm2, %v2608_v14, 0.0 }
 0x61f   : > { %2643 = vadd.xlane.f32.xlu0 %v2642_v9  ;;  %v4717_v21 = vpop.f32.mrb[42].mxu0  ;;  %v2639_v23 = vsel %vm949_vm2, %v2607_v16, 0.0  ;;  %v2498_v9 = vsub.f32 %v4650_v18, %v4058_v6  ;;  %v2501_v6 = vsub.f32 %v4661_v55, %v4067_v10  ;;  %v2504_v10 = vsub.f32 %v4692_v2, %v4103_v28 }
 0x620   : > { %2640 = vadd.xlane.f32.xlu1 %v2639_v23  ;;  %v4720_v49 = vpop.f32.mrb[43].mxu0  ;;  %v2610_v0 = vmul.f32 %v4717_v21, %v4717_v21 }
 0x621   : > { %3616 = vmatprep.mubr.msk.f32.mxu1 %vm949_vm2, %v4720_v49  ;;  %v2609_v37 = vmul.f32 %v4720_v49, %v4720_v49 }
 0x622   : > { %3617 = vmatmul.mubr.msk.f32.gmra.mrb[42].mxu1 %vm949_vm2, %v4717_v21  ;;  %v2648_v12 = vsel %vm949_vm2, %v2610_v0, 0.0  ;;  %v2514_v0 = vmul.f32 %v2498_v9, %v2498_v9 }
 0x623   : > { %2649 = vadd.xlane.f32.xlu0 %v2648_v12  ;;  %v4731_v57 = vpop.f32.mrb[44].mxu0  ;;  %v2645_v38 = vsel %vm949_vm2, %v2609_v37, 0.0  ;;  %v2499_v37 = vsub.f32 %v4648_v20, %v4055_v5  ;;  %v2502_v5 = vsub.f32 %v4678_v62, %v4085_v19  ;;  %v294_v19 = vld [vmem:[%s5216_s2 + $0x10] sm:$0xff] }
 0x624   : > { %2646 = vadd.xlane.f32.xlu1 %v2645_v38  ;;  %v4734_v58 = vpop.f32.mrb[45].mxu0  ;;  %v2612_v13 = vmul.f32 %v4731_v57, %v4731_v57  ;;  %v2530_v12 = vsel %vm949_vm2, %v2514_v0, 0.0  ;;  %v293_v0 = vld [vmem:[%s5216_s2 + $0x8] sm:$0xff] }
 0x625   : > { %3619 = vmatprep.mubr.msk.f32.mxu1 %vm949_vm2, %v4734_v58  ;;  %v2611_v8 = vmul.f32 %v4734_v58, %v4734_v58  ;;  %v2515_v38 = vmul.f32 %v2499_v37, %v2499_v37 }
 0x626   : > { %3620 = vmatmul.mubr.msk.f32.gmra.mrb[44].mxu1 %vm949_vm2, %v4731_v57  ;;  %v2654_v61 = vsel %vm949_vm2, %v2612_v13, 0.0  ;;  %v2500_v13 = vsub.f32 %v4664_v39, %v4070_v11  ;;  %v2503_v11 = vsub.f32 %v4675_v45, %v4080_v17  ;;  %v2505_v17 = vsub.f32 %v4689_v22, %v4100_v27 }
 0x627   : > { %v4743_v30 = vpop.f32.mrb[46].mxu0  ;;  %v2651_v32 = vsel %vm949_vm2, %v2611_v8, 0.0 }
 0x628   : > { %2655 = vadd.xlane.f32.xlu1 %v2654_v61  ;;  %v4747_v1 = vpop.f32.mrb[47].mxu0  ;;  %v2614_v16 = vmul.f32 %v4743_v30, %v4743_v30  ;;  %v2533_v61 = vsel %vm949_vm2, %v2515_v38, 0.0  ;;  %v2516_v8 = vmul.f32 %v2500_v13, %v2500_v13  ;;  %v3744_v38 = vpack.c.bf16 %v294_v19, %v293_v0 }
 0x629   : > { %3622 = vmatprep.mubr.msk.f32.mxu1 %vm949_vm2, %v4747_v1  ;;  %v2613_v15 = vmul.f32 %v4747_v1, %v4747_v1  ;;  %v2521_v13 = vmul.f32 %v2505_v17, %v2505_v17  ;;  %v2510_v19 = vsub.f32 %v4734_v58, %v4151_v52 }
 0x62a   : > { %3623 = vmatmul.mubr.msk.f32.gmra.mrb[46].mxu1 %vm949_vm2, %v4743_v30  ;;  %v2660_v23 = vsel %vm949_vm2, %v2614_v16, 0.0  ;;  %v2518_v16 = vmul.f32 %v2502_v5, %v2502_v5  ;;  %3745 = vmatprep.subr.bf16.mxu0 %v3744_v38  ;;  %v2766_v5 = vpop.permute.xlu0 %2765 }
 0x62b   : > { %v2657_v14 = vsel %vm949_vm2, %v2613_v15, 0.0  ;;  %v2536_v15 = vsel %vm949_vm2, %v2516_v8, 0.0  ;;  %3747 = vmatpush3.bf16.msra.mxu0 %v3744_v38  ;;  %v2769_v8 = vpop.permute.xlu1 %2768  ;;  %vm2812_vm12 = vcmp.eq.s32.totalorder %v2766_v5, %v4267_v24  ;;  %v2526_v17 = vmul.f32 %v2510_v19, %v2510_v19 }
 0x62c   : > { %2652 = vadd.xlane.f32.xlu1 %v2651_v32  ;;  %2658 = vadd.xlane.f32.xlu0 %v2657_v14  ;;  %v2517_v32 = vmul.f32 %v2501_v6, %v2501_v6  ;;  %v2542_v9 = vsel %vm949_vm2, %v2518_v16, 0.0  ;;  %v2551_v6 = vsel %vm949_vm2, %v2521_v13, 0.0  ;;  %vm2813_vm13 = vcmp.eq.s32.totalorder %v2769_v8, %v4267_v24 }
 0x62d   : > { %v2511_v38 = vsub.f32 %v4731_v57, %v4148_v51  ;;  %v2566_v52 = vsel %vm949_vm2, %v2526_v17, 0.0 }
 0x62e   : > { %v2539_v14 = vsel %vm949_vm2, %v2517_v32, 0.0  ;;  %v2507_v32 = vsub.f32 %v4703_v34, %v4115_v35  ;;  %v4802_v35 = vsel %vm2812_vm12, 1.0, %v5221_v29 }
 0x62f   : > { %v2772_v27 = vpop.permute.xlu1 %2771  ;;  %v2527_v13 = vmul.f32 %v2511_v38, %v2511_v38 }
 0x630   : > { %2661 = vadd.xlane.f32.xlu1 %v2660_v23  ;;  %v2519_v23 = vmul.f32 %v2503_v11, %v2503_v11  ;;  %v2523_v16 = vmul.f32 %v2507_v32, %v2507_v32  ;;  %v2508_v11 = vsub.f32 %v4720_v49, %v4133_v43  ;;  %vm2814_vm14 = vcmp.eq.s32.totalorder %v2772_v27, %v4267_v24 }
 0x631   : > { %v2569_v51 = vsel %vm949_vm2, %v2527_v13, 0.0  ;;  %v2513_v32 = vsub.f32 %v4743_v30, %v4163_v59  ;;  %v2787_v59 = vpop.permute.xlu0 %2786 }
 0x632   : > { %v2545_v37 = vsel %vm949_vm2, %v2519_v23, 0.0  ;;  %v2509_v23 = vsub.f32 %v4717_v21, %v4128_v41  ;;  %vm2819_vm6 = vcmp.eq.s32.totalorder %v2787_v59, %v4267_v24  ;;  %v298_v59 = vld [vmem:[%s5216_s2 + $0x30] sm:$0xff] }
 0x634   : > { %2531 = vadd.xlane.f32.xlu1 %v2530_v12  ;;  %v2520_v12 = vmul.f32 %v2504_v10, %v2504_v10  ;;  %v2775_v10 = vpop.permute.xlu1 %2774  ;;  %v2525_v0 = vmul.f32 %v2509_v23, %v2509_v23 }
 0x635   : > { %vm2815_vm15 = vcmp.eq.s32.totalorder %v2775_v10, %v4267_v24  ;;  %v4852_v10 = vsel %vm2819_vm6, 1.0, %v5221_v29  ;;  %vm3016_vm6 = vcmask 1041408  }
 0x636   : > { %v2548_v28 = vsel %vm949_vm2, %v2520_v12, 0.0  ;;  %v2563_v12 = vsel %vm949_vm2, %v2525_v0, 0.0  ;;  %v4826_v8 = vsel %vm2815_vm15, 1.0, %v5221_v29  ;;  %vm3885_vm15 = vmmov 0  }
 0x638   : > { %2534 = vadd.xlane.f32.xlu1 %v2533_v61  ;;  %v2506_v61 = vsub.f32 %v4706_v42, %v4118_v36  ;;  %v2557_v36 = vsel %vm949_vm2, %v2523_v16, 0.0  ;;  %v2778_v41 = vpop.permute.xlu1 %2777  ;;  %v2529_v16 = vmul.f32 %v2513_v32, %v2513_v32  ;;  %v296_v32 = vld [vmem:[%s5216_s2 + $0x20] sm:$0xff] }
 0x639   : > { %vm2816_vm3 = vcmp.eq.s32.totalorder %v2778_v41, %v4267_v24 }
 0x63a   : > { %v4834_v27 = vsel %vm2816_vm3, 1.0, %v5221_v29  ;;  %vm2860_vm3 = vcmask 31744  }
 0x63c   : > { %2537 = vadd.xlane.f32.xlu1 %v2536_v15  ;;  %v2522_v15 = vmul.f32 %v2506_v61, %v2506_v61  ;;  %v2512_v61 = vsub.f32 %v4747_v1, %v4166_v60  ;;  %v5222_v60 = vmov 0.0|0.0  }
 0x63d   : > { %3756 = vmatprep.subr.bf16.mxu0 %v5222_v60 }
 0x640   : > { %2540 = vadd.xlane.f32.xlu1 %v2539_v14  ;;  %v2554_v14 = vsel %vm949_vm2, %v2522_v15, 0.0  ;;  %v2528_v15 = vmul.f32 %v2512_v61, %v2512_v61 }
 0x644   : > { %2543 = vadd.xlane.f32.xlu1 %v2542_v9  ;;  %v2524_v9 = vmul.f32 %v2508_v11, %v2508_v11 }
 0x646   : > { %v2560_v43 = vsel %vm949_vm2, %v2524_v9, 0.0 }
 0x648   : > { %2546 = vadd.xlane.f32.xlu1 %v2545_v37  ;;  %v4810_v37 = vsel %vm2813_vm13, 1.0, %v5221_v29 }
 0x64c   : > { %2549 = vadd.xlane.f32.xlu1 %v2548_v28  ;;  %v4818_v28 = vsel %vm2814_vm14, 1.0, %v5221_v29 }
 0x650   : > { %2552 = vadd.xlane.f32.xlu1 %v2551_v6  ;;  %v2781_v6 = vpop.permute.xlu1 %2780 }
 0x651   : > { %vm2817_vm4 = vcmp.eq.s32.totalorder %v2781_v6, %v4267_v24 }
 0x652   : > { %v4841_v11 = vsel %vm2817_vm4, 1.0, %v5221_v29  ;;  %vm3002_vm4 = vcmask 7168  }
 0x654   : > { %2555 = vadd.xlane.f32.xlu1 %v2554_v14  ;;  %v2784_v5 = vpop.permute.xlu1 %2783  ;;  %v2572_v14 = vsel %vm949_vm2, %v2528_v15, 0.0  ;;  %v295_v15 = vld [vmem:[%s5216_s2 + $0x18] sm:$0xff] }
 0x655   : > { %vm2818_vm5 = vcmp.eq.s32.totalorder %v2784_v5, %v4267_v24  ;;  %v297_v5 = vld [vmem:[%s5216_s2 + $0x28] sm:$0xff] }
 0x656   : > { %v4847_v9 = vsel %vm2818_vm5, 1.0, %v5221_v29  ;;  %vm3014_vm5 = vcmask 1040384  }
 0x658   : > { %2558 = vadd.xlane.f32.xlu1 %v2557_v36  ;;  %v2575_v36 = vsel %vm949_vm2, %v2529_v16, 0.0  ;;  %v2790_v23 = vpop.permute.xlu1 %2789  ;;  %v3748_v16 = vpack.c.bf16 %v296_v32, %v295_v15 }
 0x659   : > { %2898 = vxpose.xlu0.b32.start [1/16] (narrow) %v4802_v35, 8  ;;  %vm2820_vm7 = vcmp.eq.s32.totalorder %v2790_v23, %v4267_v24 }
 0x65a   : > { %v4857_v0 = vsel %vm2820_vm7, 1.0, %v5221_v29  ;;  %3749 = vmatprep.subr.bf16.mxu1 %v3748_v16  ;;  %vm3018_vm7 = vcmask 1042432  }
 0x65b   : > { %3751 = vmatpush3.bf16.msra.mxu1 %v3748_v16 }
 0x65c   : > { %2561 = vadd.xlane.f32.xlu1 %v2560_v43  ;;  %v2793_v43 = vpop.permute.xlu0 %2792  ;;  %v2796_v19 = vpop.permute.xlu1 %2795 }
 0x65d   : > { %2899 = vxpose.xlu0.b32.cont [2/16] (narrow) %v4810_v37, 8  ;;  %vm2821_vm8 = vcmp.eq.s32.totalorder %v2793_v43, %v4267_v24  ;;  %vm2822_vm9 = vcmp.eq.s32.totalorder %v2796_v19, %v4267_v24 }
 0x65e   : > { %v4862_v41 = vsel %vm2821_vm8, 1.0, %v5221_v29  ;;  %v4867_v17 = vsel %vm2822_vm9, 1.0, %v5221_v29  ;;  %vm3020_vm8 = vcmask 1046528  }
 0x660   : > { %2564 = vadd.xlane.f32.xlu1 %v2563_v12  ;;  %v2799_v12 = vpop.permute.xlu0 %2798  ;;  %v2802_v38 = vpop.permute.xlu1 %2801 }
 0x661   : > { %2900 = vxpose.xlu0.b32.cont [3/16] (narrow) %v4818_v28, 8  ;;  %vm2823_vm10 = vcmp.eq.s32.totalorder %v2799_v12, %v4267_v24  ;;  %vm2824_vm11 = vcmp.eq.s32.totalorder %v2802_v38, %v4267_v24 }
 0x662   : > { %v4877_v61 = vsel %vm2824_vm11, 1.0, %v5221_v29 }
 0x664   : > { %2567 = vadd.xlane.f32.xlu1 %v2566_v52  ;;  %v4872_v52 = vsel %vm2823_vm10, 1.0, %v5221_v29  ;;  %v2805_v13 = vpop.permute.xlu0 %2804  ;;  %v2808_v6 = vpop.permute.xlu1 %2807 }
 0x665   : > { %2901 = vxpose.xlu0.b32.cont [4/16] (narrow) %v4826_v8, 8  ;;  %vm2825_vm12 = vcmp.eq.s32.totalorder %v2805_v13, %v4267_v24  ;;  %vm2826_vm13 = vcmp.eq.s32.totalorder %v2808_v6, %v4267_v24 }
 0x666   : > { %v4899_v23 = vsel %vm2826_vm13, 1.0, %v5221_v29 }
 0x668   : > { %2570 = vadd.xlane.f32.xlu1 %v2569_v51  ;;  %v4882_v51 = vsel %vm2825_vm12, 1.0, %v5221_v29 }
 0x669   : > { %2902 = vxpose.xlu0.b32.cont [5/16] (narrow) %v4834_v27, 8 }
 0x66c   : > { %2573 = vadd.xlane.f32.xlu1 %v2572_v14  ;;  %v2811_v14 = vpop.permute.xlu0 %2810 }
 0x66d   : > { %2903 = vxpose.xlu0.b32.cont [6/16] (narrow) %v4841_v11, 8  ;;  %vm2827_vm14 = vcmp.eq.s32.totalorder %v2811_v14, %v4267_v24 }
 0x66e   : > { %v4904_v43 = vsel %vm2827_vm14, 1.0, %v5221_v29 }
 0x670   : > { %2576 = vadd.xlane.f32.xlu1 %v2575_v36  ;;  %v3752_v36 = vpack.c.bf16 %v298_v59, %v297_v5 }
 0x671   : > { %2904 = vxpose.xlu0.b32.cont [7/16] (narrow) %v4847_v9, 8 }
 0x672   : > { %3753 = vmatprep.subr.bf16.mxu1 %v3752_v36 }
 0x673   : > { %3755 = vmatpush3.bf16.msra.mxu1 %v3752_v36 }
 0x675   : > { %2905 = vxpose.xlu0.b32.cont [8/16] (narrow) %v4852_v10, 8 }
 0x679   : > { %2906 = vxpose.xlu0.b32.cont [9/16] (narrow) %v4857_v0, 8 }
 0x67d   : > { %2907 = vxpose.xlu0.b32.cont [10/16] (narrow) %v4862_v41, 8 }
 0x681   : > { %2908 = vxpose.xlu0.b32.cont [11/16] (narrow) %v4867_v17, 8 }
 0x685   : > { %2909 = vxpose.xlu0.b32.cont [12/16] (narrow) %v4872_v52, 8 }
 0x689   : > { %2910 = vxpose.xlu0.b32.cont [13/16] (narrow) %v4877_v61, 8 }
 0x68d   : > { %2911 = vxpose.xlu0.b32.cont [14/16] (narrow) %v4882_v51, 8 }
 0x691   : > { %2912 = vxpose.xlu0.b32.cont [15/16] (narrow) %v4899_v23, 8 }
 0x695   : > { %2913 = vxpose.xlu0.b32.end [16/16] (narrow) %v4904_v43, 8 }
 0x69c   : > { %v2620_v19 = vpop.xlane.xlu0 %2619 }
 0x69d   : > { %v2664_v12 = vadd.f32 1e-08, %v2620_v19  ;;  %v2617_v38 = vpop.xlane.xlu1 %2616 }
 0x69e   : > { %v2663_v13 = vadd.f32 1e-08, %v2617_v38 }
 0x69f   : > { %3826 = vrsqrt.f32 %v2664_v12 }
 0x6a0   : > { %3828 = vrsqrt.f32 %v2663_v13  ;;  %v2626_v6 = vpop.xlane.xlu0 %2625 }
 0x6a1   : > { %v2666_v15 = vadd.f32 1e-08, %v2626_v6  ;;  %v2623_v32 = vpop.xlane.xlu1 %2622 }
 0x6a2   : > { %v2665_v24 = vadd.f32 1e-08, %v2623_v32 }
 0x6a3   : > { %3830 = vrsqrt.f32 %v2666_v15 }
 0x6a4   : > { %3832 = vrsqrt.f32 %v2665_v24  ;;  %v2632_v5 = vpop.xlane.xlu0 %2631 }
 0x6a5   : > { %v2668_v14 = vadd.f32 1e-08, %v2632_v5  ;;  %v2629_v16 = vpop.xlane.xlu1 %2628 }
 0x6a6   : > { %v2667_v59 = vadd.f32 1e-08, %v2629_v16 }
 0x6a7   : > { %3834 = vrsqrt.f32 %v2668_v14 }
 0x6a8   : > { %3836 = vrsqrt.f32 %v2667_v59  ;;  %v2638_v29 = vpop.xlane.xlu0 %2637 }
 0x6a9   : > { %v3827_v36 = vpop.eup %3826  ;;  %v2670_v60 = vadd.f32 1e-08, %v2638_v29  ;;  %v2635_v19 = vpop.xlane.xlu1 %2634 }
 0x6aa   : > { %v3829_v56 = vpop.eup %3828  ;;  %v2669_v38 = vadd.f32 1e-08, %v2635_v19  ;;  %v4908_v12 = vmul.f32 %v3827_v36, %v4648_v20 }
 0x6ab   : > { %3838 = vrsqrt.f32 %v2670_v60  ;;  %v4911_v13 = vmul.f32 %v3829_v56, %v4650_v18 }
 0x6ac   : > { %3840 = vrsqrt.f32 %v2669_v38  ;;  %v2644_v6 = vpop.xlane.xlu0 %2643 }
 0x6ad   : > { %v3831_v15 = vpop.eup %3830  ;;  %v2672_v32 = vadd.f32 1e-08, %v2644_v6  ;;  %v2641_v24 = vpop.xlane.xlu1 %2640  ;;  %v3757_v5 = vpack.c.bf16 %v4908_v12, %v4911_v13 }
 0x6ae   : > { %v3833_v14 = vpop.eup %3832  ;;  %v2671_v29 = vadd.f32 1e-08, %v2641_v24  ;;  %v4916_v16 = vmul.f32 %v3831_v15, %v4661_v55 }
 0x6af   : > { %3842 = vrsqrt.f32 %v2672_v32  ;;  %v4919_v20 = vmul.f32 %v3833_v14, %v4664_v39 }
 0x6b0   : > { %3844 = vrsqrt.f32 %v2671_v29  ;;  %v2650_v56 = vpop.xlane.xlu0 %2649 }
 0x6b1   : > { %v3835_v18 = vpop.eup %3834  ;;  %v2674_v60 = vadd.f32 1e-08, %v2650_v56  ;;  %v2647_v59 = vpop.xlane.xlu1 %2646 }
 0x6b2   : > { %v3837_v19 = vpop.eup %3836  ;;  %v2673_v38 = vadd.f32 1e-08, %v2647_v59  ;;  %v4924_v6 = vmul.f32 %v3835_v18, %v4675_v45 }
 0x6b3   : > { %3846 = vrsqrt.f32 %v2674_v60  ;;  %v4927_v55 = vmul.f32 %v3837_v19, %v4678_v62 }
 0x6b4   : > { %3848 = vrsqrt.f32 %v2673_v38 }
 0x6b5   : > { %v3839_v39 = vpop.eup %3838  ;;  %v2656_v15 = vpop.xlane.xlu1 %2655 }
 0x6b6   : > { %v3841_v24 = vpop.eup %3840  ;;  %v2676_v14 = vadd.f32 1e-08, %v2656_v15  ;;  %v4932_v29 = vmul.f32 %v3839_v39, %v4689_v22 }
 0x6b7   : > { %v4935_v56 = vmul.f32 %v3841_v24, %v4692_v2 }
 0x6b8   : > { %3850 = vrsqrt.f32 %v2676_v14 }
 0x6b9   : > { %v3843_v45 = vpop.eup %3842  ;;  %v2653_v18 = vpop.xlane.xlu1 %2652 }
 0x6ba   : > { %v2659_v60 = vpop.xlane.xlu0 %2658  ;;  %v3845_v59 = vpop.eup %3844  ;;  %v2675_v19 = vadd.f32 1e-08, %v2653_v18  ;;  %v4940_v32 = vmul.f32 %v3843_v45, %v4703_v34 }
 0x6bb   : > { %v2677_v38 = vadd.f32 1e-08, %v2659_v60  ;;  %v4943_v15 = vmul.f32 %v3845_v59, %v4706_v42 }
 0x6bc   : > { %3852 = vrsqrt.f32 %v2675_v19 }
 0x6bd   : > { %v3847_v22 = vpop.eup %3846  ;;  %v2662_v2 = vpop.xlane.xlu1 %2661  ;;  %v3769_v39 = vpack.c.bf16 %v4940_v32, %v4943_v15  ;;  %3854 = vrsqrt.f32 %v2677_v38 }
 0x6be   : > { %v3849_v24 = vpop.eup %3848  ;;  %v2678_v36 = vadd.f32 1e-08, %v2662_v2  ;;  %v4948_v62 = vmul.f32 %v3847_v22, %v4717_v21 }
 0x6bf   : > { %v4951_v14 = vmul.f32 %v3849_v24, %v4720_v49 }
 0x6c0   : > { %3856 = vrsqrt.f32 %v2678_v36 }
 0x6c1   : > { %v3772_v34 = vpack.c.bf16 %v4948_v62, %v4951_v14 }
 0x6c2   : > { %v3851_v42 = vpop.eup %3850 }
 0x6c3   : > { %v4959_v60 = vmul.f32 %v3851_v42, %v4731_v57 }
 0x6c6   : > { %v3853_v45 = vpop.eup %3852 }
 0x6c7   : > { %v4956_v18 = vmul.f32 %v3853_v45, %v4734_v58  ;;  %v3855_v59 = vpop.eup %3854  ;;  %v4974_v58 = vld [vmem:[%s5217_s3 + $0x3] ss:$0 sm:$0xff] }
 0x6c8   : > { %v4964_v49 = vmul.f32 %v3855_v59, %v4747_v1 }
 0x6ca   : > { %v3857_v19 = vpop.eup %3856 }
 0x6cb   : > { %v4967_v36 = vmul.f32 %v3857_v19, %v4743_v30 }
 0x6cd   : > { %v5231_v14 = vpack.c.bf16 %v4967_v36, %v4964_v49 }
 0x6e1   : > { %v3603_v57 = vpop.f32.mrb[32].mxu1 }
 0x6e2   : > { %v1934_v22 = vadd.f32 %v3603_v57, %v4974_v58  ;;  %v1928_v2 = vpop.f32.mrb[33].mxu1 }
 0x6e3   : > { %v1929_v24 = vadd.f32 %v4974_v58, %v1928_v2 }
 0x6e4   : > { %v2008_v45 = vmax.f32 %v1934_v22, 0.0  ;;  %v5226_v22 = vmov 0.0|0.0  }
 0x6e5   : > { %v2007_v42 = vmax.f32 %v1929_v24, 0.0  ;;  %v3606_v1 = vpop.f32.mrb[34].mxu1 }
 0x6e6   : > { %v1944_v30 = vadd.f32 %v3606_v1, %v4974_v58  ;;  %v1938_v59 = vpop.f32.mrb[35].mxu1 }
 0x6e7   : > { %v1939_v19 = vadd.f32 %v4974_v58, %v1938_v59  ;;  %3629 = vmatprep.mubr.msk.f32.mxu0 %vm739_vm1, %v2007_v42 }
 0x6e8   : > { %3630 = vmatmul.mubr.msk.f32.vlgmr.msra.gmra.mrb[48].mxu0 %vm739_vm1, %v2008_v45  ;;  %v2010_v21 = vmax.f32 %v1944_v30, 0.0  ;;  %v5227_v45 = vpack.c.bf16 %v4916_v16, %v4919_v20 }
 0x6e9   : > { %v2009_v38 = vmax.f32 %v1939_v19, 0.0  ;;  %3758 = vmatpush3.bf16.msra.mxu0 %v3757_v5  ;;  %v3609_v57 = vpop.f32.mrb[36].mxu1 }
 0x6ea   : > { %v1954_v2 = vadd.f32 %v3609_v57, %v4974_v58  ;;  %v1948_v24 = vpop.f32.mrb[37].mxu1  ;;  %3759 = vmatprep.subr.bf16.mxu0 %v5226_v22 }
 0x6eb   : > { %v1949_v1 = vadd.f32 %v4974_v58, %v1948_v24  ;;  %3632 = vmatprep.mubr.msk.f32.mxu0 %vm739_vm1, %v2009_v38 }
 0x6ec   : > { %3633 = vmatmul.mubr.msk.f32.gmra.mrb[50].mxu0 %vm739_vm1, %v2010_v21  ;;  %v2012_v13 = vmax.f32 %v1954_v2, 0.0  ;;  %v5228_v21 = vpack.c.bf16 %v4924_v6, %v4927_v55 }
 0x6ed   : > { %v2011_v42 = vmax.f32 %v1949_v1, 0.0  ;;  %3761 = vmatpush3.bf16.msra.mxu0 %v5227_v45  ;;  %v3612_v12 = vpop.f32.mrb[38].mxu1  ;;  %v5229_v1 = vpack.c.bf16 %v4932_v29, %v4935_v56 }
 0x6ee   : > { %v1964_v5 = vadd.f32 %v3612_v12, %v4974_v58  ;;  %v1958_v30 = vpop.f32.mrb[39].mxu1  ;;  %3762 = vmatprep.subr.bf16.mxu0 %v5226_v22 }
 0x6ef   : > { %v1959_v59 = vadd.f32 %v4974_v58, %v1958_v30  ;;  %3635 = vmatprep.mubr.msk.f32.mxu0 %vm739_vm1, %v2011_v42 }
 0x6f0   : > { %3636 = vmatmul.mubr.msk.f32.gmra.mrb[52].mxu0 %vm739_vm1, %v2012_v13  ;;  %v2014_v20 = vmax.f32 %v1964_v5, 0.0 }
 0x6f1   : > { %v2013_v38 = vmax.f32 %v1959_v59, 0.0  ;;  %3764 = vmatpush3.bf16.msra.mxu0 %v5228_v21  ;;  %v3615_v16 = vpop.f32.mrb[40].mxu1 }
 0x6f2   : > { %v1974_v19 = vadd.f32 %v3615_v16, %v4974_v58  ;;  %v1968_v57 = vpop.f32.mrb[41].mxu1  ;;  %3765 = vmatprep.subr.bf16.mxu0 %v5226_v22 }
 0x6f3   : > { %v1969_v2 = vadd.f32 %v4974_v58, %v1968_v57  ;;  %3638 = vmatprep.mubr.msk.f32.mxu0 %vm739_vm1, %v2013_v38  ;;  %v2532_v57 = vpop.xlane.xlu1 %2531 }
 0x6f4   : > { %3639 = vmatmul.mubr.msk.f32.gmra.mrb[54].mxu0 %vm739_vm1, %v2014_v20  ;;  %v2016_v55 = vmax.f32 %v1974_v19, 0.0  ;;  %v5230_v19 = vpack.c.bf16 %v4959_v60, %v4956_v18 }
 0x6f5   : > { %v2015_v24 = vmax.f32 %v1969_v2, 0.0  ;;  %3767 = vmatpush3.bf16.msra.mxu0 %v5229_v1  ;;  %v3618_v6 = vpop.f32.mrb[42].mxu1  ;;  %v2862_v1 = vsel %vm2860_vm3, %v4810_v37, 0.0  ;;  %v2870_v37 = vsel %vm2860_vm3, %v4841_v11, 0.0 }
 0x6f6   : > { %v1984_v42 = vadd.f32 %v3618_v6, %v4974_v58  ;;  %v1978_v45 = vpop.f32.mrb[43].mxu1  ;;  %3768 = vmatprep.subr.bf16.mxu0 %v5226_v22  ;;  %v2861_v6 = vsel %vm2860_vm3, %v4802_v35, 0.0 }
 0x6f7   : > { %v1979_v12 = vadd.f32 %v4974_v58, %v1978_v45  ;;  %3641 = vmatprep.mubr.msk.f32.mxu0 %vm739_vm1, %v2015_v24  ;;  %v2535_v2 = vpop.xlane.xlu1 %2534  ;;  %v2863_v49 = vadd.f32 %v2862_v1, %v2861_v6  ;;  %v2866_v45 = vsel %vm2860_vm3, %v4826_v8, 0.0 }
 0x6f8   : > { %3642 = vmatmul.mubr.msk.f32.gmra.mrb[56].mxu0 %vm739_vm1, %v2016_v55  ;;  %v2018_v56 = vmax.f32 %v1984_v42, 0.0  ;;  %v2864_v55 = vsel %vm2860_vm3, %v4818_v28, 0.0 }
 0x6f9   : > { %v2017_v13 = vmax.f32 %v1979_v12, 0.0  ;;  %3770 = vmatpush3.bf16.msra.mxu0 %v3769_v39  ;;  %v3621_v29 = vpop.f32.mrb[44].mxu1  ;;  %v2865_v42 = vadd.f32 %v2864_v55, %v2863_v49 }
 0x6fa   : > { %v1994_v5 = vadd.f32 %v3621_v29, %v4974_v58  ;;  %v1988_v30 = vpop.f32.mrb[45].mxu1  ;;  %3771 = vmatprep.subr.bf16.mxu0 %v5226_v22  ;;  %v2868_v29 = vsel %vm2860_vm3, %v4834_v27, 0.0 }
 0x6fb   : > { %v1989_v59 = vadd.f32 %v4974_v58, %v1988_v30  ;;  %3644 = vmatprep.mubr.msk.f32.mxu0 %vm739_vm1, %v2017_v13  ;;  %v2538_v18 = vpop.xlane.xlu1 %2537  ;;  %v2867_v13 = vadd.f32 %v2866_v45, %v2865_v42  ;;  %v2872_v30 = vsel %vm2860_vm3, %v4847_v9, 0.0  ;;  %v2880_v9 = vsel %vm2860_vm3, %v4867_v17, 0.0 }
 0x6fc   : > { %3645 = vmatmul.mubr.msk.f32.gmra.mrb[58].mxu0 %vm739_vm1, %v2018_v56  ;;  %v2020_v15 = vmax.f32 %v1994_v5, 0.0  ;;  %v2886_v17 = vsel %vm2860_vm3, %v4882_v51, 0.0  ;;  %v5075_v51 = vld [vmem:[%s5217_s3 + $0x4] ss:$0 sm:$0xff] }
 0x6fd   : > { %v2019_v38 = vmax.f32 %v1989_v59, 0.0  ;;  %3773 = vmatpush3.bf16.msra.mxu0 %v3772_v34  ;;  %v3624_v32 = vpop.f32.mrb[46].mxu1  ;;  %v5232_v34 = vmov 0.0   ;;  %v2869_v56 = vadd.f32 %v2868_v29, %v2867_v13 }
 0x6fe   : > { %v2004_v39 = vadd.f32 %v3624_v32, %v4974_v58  ;;  %v1998_v21 = vpop.f32.mrb[47].mxu1  ;;  %3774 = vmatprep.subr.bf16.mxu0 %v5226_v22 }
 0x6ff   : > { %v1999_v16 = vadd.f32 %v4974_v58, %v1998_v21  ;;  %3647 = vmatprep.mubr.msk.f32.mxu0 %vm739_vm1, %v2019_v38  ;;  %v2914_v58 = vpop.trf.xlu0  ;;  %v2541_v60 = vpop.xlane.xlu1 %2540  ;;  %v2871_v35 = vadd.f32 %v2870_v37, %v2869_v56  ;;  %v2874_v38 = vsel %vm2860_vm3, %v4852_v10, 0.0  ;;  %v2578_v21 = vadd.f32 %v2535_v2, %v2532_v57 }
 0x700   : > { %3648 = vmatmul.mubr.msk.f32.gmra.mrb[60].mxu0 %vm739_vm1, %v2020_v15  ;;  %v2022_v62 = vmax.f32 %v2004_v39, 0.0  ;;  %v2876_v15 = vsel %vm2860_vm3, %v4857_v0, 0.0  ;;  %v2878_v39 = vsel %vm2860_vm3, %v4862_v41, 0.0  ;;  %v2884_v41 = vsel %vm2860_vm3, %v4877_v61, 0.0 }
 0x701   : > { %v2021_v20 = vmax.f32 %v1999_v16, 0.0  ;;  %3776 = vmatpush3.bf16.msra.mxu0 %v5230_v19  ;;  %v2873_v28 = vadd.f32 %v2872_v30, %v2871_v35  ;;  %v2579_v16 = vadd.f32 %v2578_v21, %v2538_v18  ;;  %v2890_v61 = vsel %vm2860_vm3, %v4904_v43, 0.0 }
 0x702   : > { %3777 = vmatprep.subr.bf16.mxu0 %v5226_v22 }
 0x703   : > { %3650 = vmatprep.mubr.msk.f32.mxu0 %vm739_vm1, %v2021_v20  ;;  %v2544_v24 = vpop.xlane.xlu1 %2543  ;;  %v2875_v8 = vadd.f32 %v2874_v38, %v2873_v28  ;;  %v2580_v19 = vadd.f32 %v2579_v16, %v2541_v60  ;;  %v2742_v16 = vrot.slane %v4646_v44, 4 }
 0x704   : > { %3651 = vmatmul.mubr.msk.f32.gmra.mrb[62].mxu0 %vm739_vm1, %v2022_v62 }
 0x705   : > { %3779 = vmatpush3.bf16.msra.mxu0 %v5231_v14  ;;  %3717 = vmatprep.mubr.msk.f32.mxu0 %vm3885_vm15, %v5232_v34  ;;  %v2877_v27 = vadd.f32 %v2876_v15, %v2875_v8  ;;  %v2581_v62 = vadd.f32 %v2580_v19, %v2544_v24  ;;  %v2882_v34 = vsel %vm2860_vm3, %v4872_v52, 0.0  ;;  %v2888_v52 = vsel %vm2860_vm3, %v4899_v23, 0.0 }
 0x707   : > { %v2547_v22 = vpop.xlane.xlu1 %2546  ;;  %v2879_v20 = vadd.f32 %v2878_v39, %v2877_v27 }
 0x708   : > { %3718 = vmatmul.mubr.f32.vlgmr.msra.gmra.mrb[64].mxu0 %v2914_v58  ;;  %v2582_v58 = vadd.f32 %v2581_v62, %v2547_v22 }
 0x709   : > { %v2881_v14 = vadd.f32 %v2880_v9, %v2879_v20 }
 0x70b   : > { %v2550_v36 = vpop.xlane.xlu1 %2549  ;;  %v2883_v1 = vadd.f32 %v2882_v34, %v2881_v14 }
 0x70c   : > { %v2583_v0 = vadd.f32 %v2582_v58, %v2550_v36 }
 0x70d   : > { %v2885_v6 = vadd.f32 %v2884_v41, %v2883_v1 }
 0x70f   : > { %v2553_v12 = vpop.xlane.xlu1 %2552  ;;  %v2887_v49 = vadd.f32 %v2886_v17, %v2885_v6 }
 0x710   : > { %v2584_v57 = vadd.f32 %v2583_v0, %v2553_v12  ;;  %v2743_v0 = vadd.f32 %v2742_v16, %v4646_v44 }
 0x711   : > { %v2889_v42 = vadd.f32 %v2888_v52, %v2887_v49 }
 0x713   : > { %v2556_v5 = vpop.xlane.xlu1 %2555  ;;  %v2891_v29 = vadd.f32 %v2890_v61, %v2889_v42 }
 0x714   : > { %v2585_v18 = vadd.f32 %v2584_v57, %v2556_v5 }
 0x715   : > { %v2892_v30 = vrot.slane %v2891_v29, 4 }
 0x717   : > { %v2559_v59 = vpop.xlane.xlu1 %2558  ;;  %v2893_v27 = vadd.f32 %v2892_v30, %v2891_v29 }
 0x718   : > { %v2586_v60 = vadd.f32 %v2585_v18, %v2559_v59 }
 0x719   : > { %v2894_v14 = vrot.slane %v2893_v27, 2 }
 0x71b   : > { %v2562_v32 = vpop.xlane.xlu1 %2561  ;;  %v2895_v18 = vadd.f32 %v2894_v14, %v2893_v27 }
 0x71c   : > { %v2587_v24 = vadd.f32 %v2586_v60, %v2562_v32 }
 0x71f   : > { %v2565_v11 = vpop.xlane.xlu1 %2564 }
 0x720   : > { %v2588_v22 = vadd.f32 %v2587_v24, %v2565_v11  ;;  %v2744_v24 = vrot.slane %v2743_v0, 2 }
 0x723   : > { %v2568_v10 = vpop.xlane.xlu1 %2567 }
 0x724   : > { %v2589_v36 = vadd.f32 %v2588_v22, %v2568_v10  ;;  %v2896_v22 = vrot.slane %v2895_v18, 1 }
 0x727   : > { %v2571_v2 = vpop.xlane.xlu1 %2570 }
 0x728   : > { %v2590_v45 = vadd.f32 %v2589_v36, %v2571_v2 }
 0x72b   : > { %v2574_v55 = vpop.xlane.xlu1 %2573 }
 0x72c   : > { %v2591_v13 = vadd.f32 %v2590_v45, %v2574_v55  ;;  %v2745_v45 = vadd.f32 %v2744_v24, %v2743_v0 }
 0x72e   : > { %v2746_v30 = vrot.slane %v2745_v45, 1 }
 0x72f   : > { %v2577_v12 = vpop.xlane.xlu1 %2576 }
 0x730   : > { %v2592_v56 = vadd.f32 %v2591_v13, %v2577_v12 }
 0x732   : > { %v2593_v59 = vrot.slane %v2592_v56, 4 }
 0x734   : > { %v2594_v39 = vadd.f32 %v2593_v59, %v2592_v56 }
 0x736   : > { %v2595_v10 = vrot.slane %v2594_v39, 2 }
 0x738   : > { %v2596_v6 = vadd.f32 %v2595_v10, %v2594_v39  ;;  %v2747_v39 = vadd.f32 %v2746_v30, %v2745_v45 }
 0x73a   : > { %v2597_v36 = vrot.slane %v2596_v6, 1 }
 0x7bb   : > { %v3631_v5 = vpop.f32.mrb[48].mxu0 }
 0x7bc   : > { %v2147_v37 = vadd.f32 %v3631_v5, %v5075_v51  ;;  %v2141_v23 = vpop.f32.mrb[49].mxu0  ;;  %v2897_v5 = vadd.f32 %v2896_v22, %v2895_v18  ;;  %v5122_v18 = vld [vmem:[%s5217_s3 + $0x5] ss:$0 sm:$0xff] }
 0x7bd   : > { %v2142_v35 = vadd.f32 %v5075_v51, %v2141_v23 }
 0x7be   : > { %v2221_v38 = vmax.f32 %v2147_v37, 0.0  ;;  %v2598_v37 = vadd.f32 %v2597_v36, %v2596_v6  ;;  %v2436_v36 = vcvt.s32.f32 %v4533_v63 }
 0x7bf   : > { %v2220_v28 = vmax.f32 %v2142_v35, 0.0  ;;  %v3634_v43 = vpop.f32.mrb[50].mxu0 }
 0x7c0   : > { %v2157_v8 = vadd.f32 %v3634_v43, %v5075_v51  ;;  %v2151_v32 = vpop.f32.mrb[51].mxu0 }
 0x7c1   : > { %v2152_v15 = vadd.f32 %v5075_v51, %v2151_v32  ;;  %3661 = vmatprep.mubr.msk.f32.mxu1 %vm312_vm0, %v2220_v28  ;;  %v3003_v32 = vsel %vm3002_vm4, %v2598_v37, 0.0 }
 0x7c2   : > { %3662 = vmatmul.mubr.msk.f32.vlgmr.msra.gmra.mrb[48].mxu1 %vm312_vm0, %v2221_v38  ;;  %v2223_v20 = vmax.f32 %v2157_v8, 0.0  ;;  %v3001_v8 = vsel %vm2860_vm3, %v2897_v5, 0.0  ;;  %v2438_v5 = vcvt.s32.f32 %v4548_v48 }
 0x7c3   : > { %v2222_v21 = vmax.f32 %v2152_v15, 0.0  ;;  %v3637_v11 = vpop.f32.mrb[52].mxu0 }
 0x7c4   : > { %v2167_v9 = vadd.f32 %v3637_v11, %v5075_v51  ;;  %v2161_v19 = vpop.f32.mrb[53].mxu0 }
 0x7c5   : > { %v2162_v62 = vadd.f32 %v5075_v51, %v2161_v19  ;;  %3664 = vmatprep.mubr.msk.f32.mxu1 %vm312_vm0, %v2222_v21  ;;  %v3009_v19 = vrot.slane %v3003_v32, 6 }
 0x7c6   : > { %3665 = vmatmul.mubr.msk.f32.gmra.mrb[50].mxu1 %vm312_vm0, %v2223_v20  ;;  %v2225_v1 = vmax.f32 %v2167_v9, 0.0  ;;  %v3006_v20 = vrot.slane %v3001_v8, 7 }
 0x7c7   : > { %v2224_v34 = vmax.f32 %v2162_v62, 0.0  ;;  %v3640_v58 = vpop.f32.mrb[54].mxu0 }
 0x7c8   : > { %v2177_v41 = vadd.f32 %v3640_v58, %v5075_v51  ;;  %v2171_v57 = vpop.f32.mrb[55].mxu0 }
 0x7c9   : > { %v2172_v2 = vadd.f32 %v5075_v51, %v2171_v57  ;;  %3667 = vmatprep.mubr.msk.f32.mxu1 %vm312_vm0, %v2224_v34  ;;  %v3000_v34 = vsel %vm739_vm1, %v2747_v39, 0.0  ;;  %vm2465_vm1 = vcmask 269312  }
 0x7ca   : > { %3668 = vmatmul.mubr.msk.f32.gmra.mrb[52].mxu1 %vm312_vm0, %v2225_v1  ;;  %v2227_v49 = vmax.f32 %v2177_v41, 0.0 }
 0x7cb   : > { %v2226_v17 = vmax.f32 %v2172_v2, 0.0  ;;  %v3643_v60 = vpop.f32.mrb[56].mxu0 }
 0x7cc   : > { %v2187_v55 = vadd.f32 %v3643_v60, %v5075_v51  ;;  %v2181_v52 = vpop.f32.mrb[57].mxu0 }
 0x7cd   : > { %v2182_v44 = vadd.f32 %v5075_v51, %v2181_v52  ;;  %3670 = vmatprep.mubr.msk.f32.mxu1 %vm312_vm0, %v2226_v17  ;;  %v2434_v17 = vcvt.s32.f32 %v4522_v33 }
 0x7ce   : > { %3671 = vmatmul.mubr.msk.f32.gmra.mrb[54].mxu1 %vm312_vm0, %v2227_v49  ;;  %v2229_v12 = vmax.f32 %v2187_v55, 0.0  ;;  %v2433_v49 = vcvt.s32.f32 %v4525_v47  ;;  %v2435_v47 = vcvt.s32.f32 %v4537_v40 }
 0x7cf   : > { %v2228_v42 = vmax.f32 %v2182_v44, 0.0  ;;  %v3646_v61 = vpop.f32.mrb[58].mxu0 }
 0x7d0   : > { %v2197_v13 = vadd.f32 %v3646_v61, %v5075_v51  ;;  %v2191_v29 = vpop.f32.mrb[59].mxu0 }
 0x7d1   : > { %v2192_v56 = vadd.f32 %v5075_v51, %v2191_v29  ;;  %3673 = vmatprep.mubr.msk.f32.mxu1 %vm312_vm0, %v2228_v42 }
 0x7d2   : > { %3674 = vmatmul.mubr.msk.f32.gmra.mrb[56].mxu1 %vm312_vm0, %v2229_v12  ;;  %v2231_v59 = vmax.f32 %v2197_v13, 0.0 }
 0x7d3   : > { %v2230_v23 = vmax.f32 %v2192_v56, 0.0  ;;  %v3649_v35 = vpop.f32.mrb[60].mxu0 }
 0x7d4   : > { %v2207_v28 = vadd.f32 %v3649_v35, %v5075_v51  ;;  %v2201_v43 = vpop.f32.mrb[61].mxu0  ;;  %v2437_v35 = vcvt.s32.f32 %v4554_v3 }
 0x7d5   : > { %v2202_v38 = vadd.f32 %v5075_v51, %v2201_v43  ;;  %3676 = vmatprep.mubr.msk.f32.mxu1 %vm312_vm0, %v2230_v23 }
 0x7d6   : > { %3677 = vmatmul.mubr.msk.f32.gmra.mrb[58].mxu1 %vm312_vm0, %v2231_v59  ;;  %v2233_v21 = vmax.f32 %v2207_v28, 0.0 }
 0x7d7   : > { %v2232_v15 = vmax.f32 %v2202_v38, 0.0  ;;  %v3652_v27 = vpop.f32.mrb[62].mxu0  ;;  %v2440_v38 = vcvt.s32.f32 %v4564_v25 }
 0x7d8   : > { %v2217_v11 = vadd.f32 %v3652_v27, %v5075_v51  ;;  %v2211_v16 = vpop.f32.mrb[63].mxu0 }
 0x7d9   : > { %v2212_v9 = vadd.f32 %v5075_v51, %v2211_v16  ;;  %3679 = vmatprep.mubr.msk.f32.mxu1 %vm312_vm0, %v2232_v15  ;;  %v3015_v51 = vsel %vm3014_vm5, %v3000_v34, %v3006_v20  ;;  %v2439_v15 = vcvt.s32.f32 %v4568_v26  ;;  %v2442_v16 = vcvt.s32.f32 %v4580_v31 }
 0x7da   : > { %3680 = vmatmul.mubr.msk.f32.gmra.mrb[60].mxu1 %vm312_vm0, %v2233_v21  ;;  %v2235_v10 = vmax.f32 %v2217_v11, 0.0  ;;  %v3017_v41 = vsel %vm3016_vm6, %v3015_v51, %v3009_v19  ;;  %v2441_v19 = vcvt.s32.f32 %v4586_v50  ;;  %v2443_v51 = vcvt.s32.f32 %v4600_v4 }
 0x7db   : > { %v2234_v62 = vmax.f32 %v2212_v9, 0.0  ;;  %v2996_v14 = vpop.f32.mrb[64].mxu0 }
 0x7dc   : > { %v3004_v58 = vsel %vm949_vm2, %v2996_v14, 0.0  ;;  %v3719_v0 = vpop.f32.mrb[65].mxu0 }
 0x7dd   : > { %v3012_v1 = vrot.slane %v3004_v58, 5  ;;  %3682 = vmatprep.mubr.msk.f32.mxu1 %vm312_vm0, %v2234_v62  ;;  %v2444_v58 = vcvt.s32.f32 %v4596_v7 }
 0x7de   : > { %3683 = vmatmul.mubr.msk.f32.gmra.mrb[62].mxu1 %vm312_vm0, %v2235_v10 }
 0x7df   : > { %v3019_v57 = vsel %vm3018_vm7, %v3017_v41, %v3012_v1 }
 0x7e0   : > { %v3021_v2 = vsel %vm3020_vm8, %v3019_v57, 0.0 }
 0x7e1   : > { %3022 = vst [vmem:[%s265_s18] sm:$0xff] %v3021_v2 }
 0x895   : > { %v3663_v6 = vpop.f32.mrb[48].mxu1 }
 0x896   : > { %v2360_v60 = vadd.f32 %v3663_v6, %v5122_v18  ;;  %v2354_v24 = vpop.f32.mrb[49].mxu1 }
 0x897   : > { %v2355_v55 = vadd.f32 %v5122_v18, %v2354_v24 }
 0x898   : > { %v2450_v52 = vsel %vm312_vm0, %v2360_v60, %v2434_v17  ;;  %v2446_v17 = vcvt.s32.f32 %v4612_v46 }
 0x899   : > { %v2467_v33 = vsel %vm2465_vm1, %v2450_v52, 0.0  ;;  %v2449_v44 = vsel %vm312_vm0, %v2355_v55, %v2433_v49  ;;  %v3666_v22 = vpop.f32.mrb[50].mxu1  ;;  %v2445_v49 = vcvt.s32.f32 %v4616_v54 }
 0x89a   : > { %2483 = vst [vmem:[%s5131_s23 + $0x8] sm:$0xff] %v2467_v33  ;;  %v2466_v42 = vsel %vm2465_vm1, %v2449_v44, 0.0  ;;  %v2370_v61 = vadd.f32 %v3666_v22, %v5122_v18  ;;  %v2364_v45 = vpop.f32.mrb[51].mxu1  ;;  %v2448_v22 = vcvt.s32.f32 %v4626_v53 }
 0x89b   : > { %2482 = vst [vmem:[%s5131_s23] sm:$0xff] %v2466_v42  ;;  %v2365_v12 = vadd.f32 %v5122_v18, %v2364_v45 }
 0x89c   : > { %v2452_v13 = vsel %vm312_vm0, %v2370_v61, %v2436_v36  ;;  %v5233_v61 = vld [vmem:[#allocation2_spill] sm:$0xff] }
 0x89d   : > { %v2469_v29 = vsel %vm2465_vm1, %v2452_v13, 0.0  ;;  %v2451_v56 = vsel %vm312_vm0, %v2365_v12, %v2435_v47  ;;  %v3669_v63 = vpop.f32.mrb[52].mxu1  ;;  %v2447_v45 = vcvt.s32.f32 %v5233_v61 }
 0x89e   : > { %2485 = vst [vmem:[%s5131_s23 + $0x18] sm:$0xff] %v2469_v29  ;;  %v2468_v37 = vsel %vm2465_vm1, %v2451_v56, 0.0  ;;  %v2380_v23 = vadd.f32 %v3669_v63, %v5122_v18  ;;  %v2374_v40 = vpop.f32.mrb[53].mxu1 }
 0x89f   : > { %2484 = vst [vmem:[%s5131_s23 + $0x10] sm:$0xff] %v2468_v37  ;;  %v2375_v30 = vadd.f32 %v5122_v18, %v2374_v40 }
 0x8a0   : > { %v2454_v59 = vsel %vm312_vm0, %v2380_v23, %v2438_v5 }
 0x8a1   : > { %v2471_v28 = vsel %vm2465_vm1, %v2454_v59, 0.0  ;;  %v2453_v43 = vsel %vm312_vm0, %v2375_v30, %v2437_v35  ;;  %v3672_v48 = vpop.f32.mrb[54].mxu1 }
 0x8a2   : > { %2487 = vst [vmem:[%s5131_s23 + $0x28] sm:$0xff] %v2471_v28  ;;  %v2470_v8 = vsel %vm2465_vm1, %v2453_v43, 0.0  ;;  %v2390_v32 = vadd.f32 %v3672_v48, %v5122_v18  ;;  %v2384_v3 = vpop.f32.mrb[55].mxu1 }
 0x8a3   : > { %2486 = vst [vmem:[%s5131_s23 + $0x20] sm:$0xff] %v2470_v8  ;;  %v2385_v27 = vadd.f32 %v5122_v18, %v2384_v3 }
 0x8a4   : > { %v2456_v39 = vsel %vm312_vm0, %v2390_v32, %v2440_v38 }
 0x8a5   : > { %v2473_v21 = vsel %vm2465_vm1, %v2456_v39, 0.0  ;;  %v2455_v11 = vsel %vm312_vm0, %v2385_v27, %v2439_v15  ;;  %v3675_v25 = vpop.f32.mrb[56].mxu1 }
 0x8a6   : > { %2489 = vst [vmem:[%s5131_s23 + $0x38] sm:$0xff] %v2473_v21  ;;  %v2472_v20 = vsel %vm2465_vm1, %v2455_v11, 0.0  ;;  %v2400_v9 = vadd.f32 %v3675_v25, %v5122_v18  ;;  %v2394_v26 = vpop.f32.mrb[57].mxu1 }
 0x8a7   : > { %2488 = vst [vmem:[%s5131_s23 + $0x30] sm:$0xff] %v2472_v20  ;;  %v2395_v62 = vadd.f32 %v5122_v18, %v2394_v26 }
 0x8a8   : > { %v2458_v14 = vsel %vm312_vm0, %v2400_v9, %v2442_v16 }
 0x8a9   : > { %v2475_v10 = vsel %vm2465_vm1, %v2458_v14, 0.0  ;;  %v2457_v34 = vsel %vm312_vm0, %v2395_v62, %v2441_v19  ;;  %v3678_v31 = vpop.f32.mrb[58].mxu1 }
 0x8aa   : > { %2491 = vst [vmem:[%s5131_s23 + $0x48] sm:$0xff] %v2475_v10  ;;  %v2474_v0 = vsel %vm2465_vm1, %v2457_v34, 0.0  ;;  %v2410_v1 = vadd.f32 %v3678_v31, %v5122_v18  ;;  %v2404_v50 = vpop.f32.mrb[59].mxu1 }
 0x8ab   : > { %2490 = vst [vmem:[%s5131_s23 + $0x40] sm:$0xff] %v2474_v0  ;;  %v2405_v41 = vadd.f32 %v5122_v18, %v2404_v50 }
 0x8ac   : > { %v2460_v57 = vsel %vm312_vm0, %v2410_v1, %v2444_v58 }
 0x8ad   : > { %v2477_v2 = vsel %vm2465_vm1, %v2460_v57, 0.0  ;;  %v2459_v6 = vsel %vm312_vm0, %v2405_v41, %v2443_v51  ;;  %v3681_v7 = vpop.f32.mrb[60].mxu1 }
 0x8ae   : > { %2493 = vst [vmem:[%s5131_s23 + $0x58] sm:$0xff] %v2477_v2  ;;  %v2476_v60 = vsel %vm2465_vm1, %v2459_v6, 0.0  ;;  %v2420_v24 = vadd.f32 %v3681_v7, %v5122_v18  ;;  %v2414_v4 = vpop.f32.mrb[61].mxu1 }
 0x8af   : > { %2492 = vst [vmem:[%s5131_s23 + $0x50] sm:$0xff] %v2476_v60  ;;  %v2415_v55 = vadd.f32 %v5122_v18, %v2414_v4 }
 0x8b0   : > { %v2462_v52 = vsel %vm312_vm0, %v2420_v24, %v2446_v17 }
 0x8b1   : > { %v2479_v33 = vsel %vm2465_vm1, %v2462_v52, 0.0  ;;  %v2461_v46 = vsel %vm312_vm0, %v2415_v55, %v2445_v49  ;;  %v3684_v44 = vpop.f32.mrb[62].mxu1 }
 0x8b2   : > { %2495 = vst [vmem:[%s5131_s23 + $0x68] sm:$0xff] %v2479_v33  ;;  %v2478_v36 = vsel %vm2465_vm1, %v2461_v46, 0.0  ;;  %v2430_v42 = vadd.f32 %v3684_v44, %v5122_v18  ;;  %v2424_v54 = vpop.f32.mrb[63].mxu1 }
 0x8b3   : > { %2494 = vst [vmem:[%s5131_s23 + $0x60] sm:$0xff] %v2478_v36  ;;  %v2425_v47 = vadd.f32 %v5122_v18, %v2424_v54 }
 0x8b4   : > { %v2464_v12 = vsel %vm312_vm0, %v2430_v42, %v2448_v22 }
 0x8b5   : > { %v2481_v13 = vsel %vm2465_vm1, %v2464_v12, 0.0  ;;  %v2463_v29 = vsel %vm312_vm0, %v2425_v47, %v2447_v45 }
 0x8b6   : > { %2497 = vst [vmem:[%s5131_s23 + $0x78] sm:$0xff] %v2481_v13  ;;  %v2480_v53 = vsel %vm2465_vm1, %v2463_v29, 0.0 }
 0x8b7   : > { %2496 = vst [vmem:[%s5131_s23 + $0x70] sm:$0xff] %v2480_v53 }
 0x8b8 PF: > { %s17_s21 = sadd.s32 1, %s3880_s21  }
 0x8b9   : > { %p14_p5 = scmp.ge.s32.totalorder %s17_s21, 4  }
 0x8bb   :  { %16 = sbr.rel (!%p14_p5) target bundleno = 1 (0x1), region = 82 }

</bundles_post_ra>
